<compile_context>
chip_gen: v7x
topology: tpu7x:2x2x1
jax: 0.10.0
libtpu: 0.0.40
codegen_flags: <defaults>
</compile_context>

<pallas_src>
import functools
import math

import numpy as np
import jax
import jax.numpy as jnp
from jax.experimental import pallas as pl
from jax.experimental.pallas import tpu as pltpu

_HALF_LOG_2PI = 0.5 * math.log(2.0 * math.pi)
_LOG2 = math.log(2.0)


def _round_up(n, m):
    return ((n + m - 1) // m) * m


def _pad2d(a, rows, cols, dtype=jnp.float32):
    a = a.astype(jnp.float32)
    pr, pc = rows - a.shape[0], cols - a.shape[1]
    if pr or pc:
        a = jnp.pad(a, ((0, pr), (0, pc)))  # zero padding is a correctness invariant
    return a.astype(dtype)


def _choose_tile_b(batch, d_pad):
    """Pick the batch tile size TB."""
    if batch <= 256:
        # Single tile, rounded to the bf16 sublane pack (16) only — avoids the
        # ~128x wasted HBM / softplus work of padding a tiny batch to 256 rows.
        return _round_up(max(batch, 1), 16)
    # The f32 in-kernel temporaries (x upcast, logits, bern, ...) dominate the
    # VMEM footprint: keep ~4 of them under ~24 MiB.
    cap = max(256, ((24 << 20) // (16 * d_pad)) // 256 * 256)
    tb = min(1024, cap)
    # At least two grid steps: lets the "parallel" batch axis shard across the
    # two TensorCores on v7x and keeps the x DMA pipelined everywhere.
    half = _round_up((batch + 1) // 2, 256)
    return max(256, min(tb, half))


def _vae_elbo_kernel(x_ref, eps_ref, wmu_ref, wls_ref, benc_ref, wdec_ref,
                     bdec_ref, stats_ref, z_ref, mu_ref, ls_ref, *, n_pad_cols):
    xq = x_ref[...]                       # (TB, D_pad), bf16 (or f32) observations
    x = xq.astype(jnp.float32)

    # --- encoder q(z|x): two thin MXU matmuls in the x dtype (single pass when
    #     bf16), f32 accumulation; hides under the next tile's x DMA ----------
    mu = jnp.dot(xq, wmu_ref[...], preferred_element_type=jnp.float32)
    mu = mu + benc_ref[0:1, :]
    log_sigma = jnp.dot(xq, wls_ref[...], preferred_element_type=jnp.float32)
    log_sigma = log_sigma + benc_ref[1:2, :]

    # --- reparameterized sample z = mu + sigma * eps -------------------------
    sigma = jnp.exp(log_sigma)
    z = mu + sigma * eps_ref[...]

    # --- decoder p(x|z): Bernoulli logits (f32 MXU matmul, K = L) ------------
    logits = jnp.dot(z, wdec_ref[...], preferred_element_type=jnp.float32)
    logits = logits + bdec_ref[...]       # (1, D_pad) bias, broadcast over rows

    # log p(x|z) = sum_d [ x*l - softplus(l) ]  (Bernoulli with logits).
    # Zero-padded feature columns (x=0, w_dec col=0, b_dec col=0) each add
    # exactly -log(2); undo with one compile-time scalar instead of an
    # iota/where mask over the whole (TB, D_pad) tile.
    bern = x * logits - jnp.logaddexp(logits, 0.0)
    log_px = jnp.sum(bern, axis=-1)
    if n_pad_cols:
        log_px = log_px + (n_pad_cols * _LOG2)

    # log p(z) under N(0, I); log q(z|x) under N(mu, sigma^2).
    log_pz = jnp.sum(-0.5 * z * z - _HALF_LOG_2PI, axis=-1)
    u = (z - mu) * jnp.exp(-log_sigma)
    log_qz = jnp.sum(-log_sigma - _HALF_LOG_2PI - 0.5 * u * u, axis=-1)
    kl = log_qz - log_pz

    # Lane-dense diagnostics slab (batch on lanes): row 0 = log_px, row 1 = kl.
    stats_ref[0:1, :] = log_px[None, :]
    stats_ref[1:2, :] = kl[None, :]

    # Posterior parameters + sample for the module's `outputs` dict (tiny).
    z_ref[...] = z
    mu_ref[...] = mu
    ls_ref[...] = log_sigma


def variational_inference_pallas(x_flat, eps, w_enc, b_enc, w_dec, b_dec,
                                 *, tile_b=None, x_dtype=jnp.bfloat16):
    """Fused encoder + reparameterization + VAE ELBO.

    Returns (loss, diagnostics, outputs) mirroring VariationalInference.forward
    with beta = 0: elbo = log_px, loss = -log_px.mean().
    """
    B, D = x_flat.shape
    L = eps.shape[1]
    assert w_enc.shape == (D, 2 * L)

    D_pad = _round_up(D, 128)
    TB = tile_b if tile_b is not None else _choose_tile_b(B, D_pad)
    TB = _round_up(TB, 16)
    B_pad = _round_up(B, TB)
    n_tiles = B_pad // TB
    x_bytes = jnp.dtype(x_dtype).itemsize

    # Zero padding everywhere keeps the in-kernel -log(2)/column fix exact.
    x_p = _pad2d(x_flat, B_pad, D_pad, dtype=x_dtype)
    eps_p = _pad2d(eps, B_pad, L)
    w_mu_p = _pad2d(w_enc[:, :L], D_pad, L, dtype=x_dtype)
    w_ls_p = _pad2d(w_enc[:, L:], D_pad, L, dtype=x_dtype)
    b_enc2 = jnp.stack([b_enc[:L], b_enc[L:]], axis=0).astype(jnp.float32)
    w_dec_p = _pad2d(w_dec, L, D_pad)
    b_dec_p = _pad2d(jnp.reshape(b_dec, (1, -1)), 1, D_pad)

    kernel = functools.partial(_vae_elbo_kernel, n_pad_cols=D_pad - D)

    # VMEM footprint estimate -> right-sized limit (24..40 MiB): above v5e's
    # 16 MiB scoped default, well under v7x's 64 MiB physical.
    est = (2 * TB * D_pad * x_bytes            # x tile, double-buffered
           + 2 * TB * L * 4                    # eps tile, double-buffered
           + 2 * D_pad * L * x_bytes           # encoder weights (VMEM-resident)
           + (L + 1) * D_pad * 4 + 2 * L * 4   # decoder weights + biases
           + 2 * (2 * TB + 3 * TB * L) * 4     # outputs, double-buffered
           + 4 * TB * D_pad * 4)               # f32 temporaries in-kernel
    vmem_limit = int(min(max(est * 3 // 2, 24 << 20), 40 << 20))

    cost = pl.CostEstimate(
        flops=int(2 * B_pad * D_pad * (2 * L) + 2 * B_pad * L * D_pad
                  + 12 * B_pad * D_pad + 12 * B_pad * L),
        transcendentals=int(2 * B_pad * D_pad + 3 * B_pad * L),
        bytes_accessed=int(B_pad * D_pad * x_bytes + B_pad * L * 4
                           + 2 * D_pad * L * x_bytes + (L + 1) * D_pad * 4
                           + 2 * B_pad * 4 + 3 * B_pad * L * 4),
    )

    stats, z_o, mu_o, ls_o = pl.pallas_call(
        kernel,
        out_shape=[
            jax.ShapeDtypeStruct((2, B_pad), jnp.float32),   # [log_px; kl]
            jax.ShapeDtypeStruct((B_pad, L), jnp.float32),   # z
            jax.ShapeDtypeStruct((B_pad, L), jnp.float32),   # mu
            jax.ShapeDtypeStruct((B_pad, L), jnp.float32),   # log_sigma
        ],
        grid=(n_tiles,),
        in_specs=[
            pl.BlockSpec((TB, D_pad), lambda i: (i, 0)),     # x tile (bf16)
            pl.BlockSpec((TB, L), lambda i: (i, 0)),         # eps tile
            pl.BlockSpec((D_pad, L), lambda i: (0, 0)),      # w_enc (mu), resident
            pl.BlockSpec((D_pad, L), lambda i: (0, 0)),      # w_enc (log_sigma), resident
            pl.BlockSpec((2, L), lambda i: (0, 0)),          # b_enc packed, resident
            pl.BlockSpec((L, D_pad), lambda i: (0, 0)),      # w_dec, resident
            pl.BlockSpec((1, D_pad), lambda i: (0, 0)),      # b_dec, resident
        ],
        out_specs=[
            pl.BlockSpec((2, TB), lambda i: (0, i)),         # stats, batch on lanes
            pl.BlockSpec((TB, L), lambda i: (i, 0)),
            pl.BlockSpec((TB, L), lambda i: (i, 0)),
            pl.BlockSpec((TB, L), lambda i: (i, 0)),
        ],
        compiler_params=pltpu.CompilerParams(
            dimension_semantics=("parallel",),
            vmem_limit_bytes=vmem_limit,
        ),
        cost_estimate=cost,
    )(x_p, eps_p, w_mu_p, w_ls_p, b_enc2, w_dec_p, b_dec_p)

    log_px = stats[0, :B]
    kl = stats[1, :B]
    loss = -jnp.mean(log_px)     # beta = 0: elbo = beta_elbo = log_px
    diagnostics = {"elbo": log_px, "log_px": log_px, "kl": kl}
    outputs = {"z": z_o[:B], "qz_mu": mu_o[:B], "qz_log_sigma": ls_o[:B]}
    # TODO(synk): optionally also write the Bernoulli logits ('px' params) back
    # to HBM if a caller needs them; skipped to avoid doubling HBM writes.
    return loss, diagnostics, outputs


def reference_jax(x_flat, eps, w_enc, b_enc, w_dec, b_dec, quant_dtype=None):
    """Pure-JAX reference of the fused forward (PyTorch semantics).

    quant_dtype=bf16 reproduces the kernel's input quantization exactly;
    quant_dtype=None is the unmodified f32 module semantics.
    """
    L = eps.shape[1]
    x = x_flat
    w_mu, w_ls = w_enc[:, :L], w_enc[:, L:]
    if quant_dtype is not None:
        x = x.astype(quant_dtype).astype(jnp.float32)
        w_mu = w_mu.astype(quant_dtype).astype(jnp.float32)
        w_ls = w_ls.astype(quant_dtype).astype(jnp.float32)
    mu = x @ w_mu + b_enc[:L]
    log_sigma = x @ w_ls + b_enc[L:]
    z = mu + jnp.exp(log_sigma) * eps
    logits = z @ w_dec + jnp.reshape(b_dec, (1, -1))
    log_px = jnp.sum(x * logits - jnp.logaddexp(logits, 0.0), axis=-1)
    log_pz = jnp.sum(-0.5 * z * z - _HALF_LOG_2PI, axis=-1)
    u = (z - mu) * jnp.exp(-log_sigma)
    log_qz = jnp.sum(-log_sigma - _HALF_LOG_2PI - 0.5 * u * u, axis=-1)
    kl = log_qz - log_pz
    loss = -jnp.mean(log_px)
    return loss, log_px, kl, z, mu, log_sigma


if __name__ == "__main__":
    key = jax.random.PRNGKey(0)
    k_x, k_we, k_be, k_wd, k_bd, k_eps = jax.random.split(key, 6)

    # Small shapes consistent with an image VAE: NCHW input (2, 4, 16, 16).
    B, C, H, W = 2, 4, 16, 16
    D = C * H * W            # 1024 observed features
    L = 32                   # latent dim

    x = jax.random.uniform(k_x, (B, C, H, W), dtype=jnp.float32)   # in [0, 1]
    x_flat = x.reshape(B, D)

    w_enc = 0.05 * jax.random.normal(k_we, (D, 2 * L), dtype=jnp.float32)
    b_enc = 0.01 * jax.random.normal(k_be, (2 * L,), dtype=jnp.float32)
    w_dec = 0.05 * jax.random.normal(k_wd, (L, D), dtype=jnp.float32)
    b_dec = 0.01 * jax.random.normal(k_bd, (1, D), dtype=jnp.float32)
    eps = jax.random.normal(k_eps, (B, L), dtype=jnp.float32)

    loss, diag, outs = variational_inference_pallas(x_flat, eps, w_enc, b_enc,
                                                    w_dec, b_dec)
    jax.block_until_ready((loss, diag["kl"], outs["z"]))

    # Tight check: same pipeline with the kernel's bf16 input quantization,
    # everything else in f32.
    r_loss, r_log_px, r_kl, r_z, r_mu, r_ls = reference_jax(
        x_flat, eps, w_enc, b_enc, w_dec, b_dec, quant_dtype=jnp.bfloat16)
    np.testing.assert_allclose(np.asarray(loss), np.asarray(r_loss),
                               rtol=1e-4, atol=1e-3)
    np.testing.assert_allclose(np.asarray(diag["log_px"]), np.asarray(r_log_px),
                               rtol=1e-4, atol=1e-3)
    np.testing.assert_allclose(np.asarray(diag["kl"]), np.asarray(r_kl),
                               rtol=1e-4, atol=5e-3)
    np.testing.assert_allclose(np.asarray(outs["z"]), np.asarray(r_z),
                               rtol=1e-4, atol=1e-3)
    np.testing.assert_allclose(np.asarray(outs["qz_mu"]), np.asarray(r_mu),
                               rtol=1e-4, atol=1e-3)
    np.testing.assert_allclose(np.asarray(outs["qz_log_sigma"]),
                               np.asarray(r_ls), rtol=1e-4, atol=1e-3)

    # Loose sanity check vs. full-f32 module semantics: the only intended
    # deviation is the bf16 quantization of the x stream / encoder weights.
    f_loss, *_ = reference_jax(x_flat, eps, w_enc, b_enc, w_dec, b_dec,
                               quant_dtype=None)
    np.testing.assert_allclose(np.asarray(loss), np.asarray(f_loss),
                               rtol=2e-2, atol=1.0)

    print("KERNEL_OK")
</pallas_src>

<mosaic_0001>
module attributes {stable_mosaic.version = 11 : i64} {
  func.func @_vae_elbo_kernel(%arg0: i32, %arg1: memref<16x1024xbf16, #tpu.memory_space<vmem>>, %arg2: memref<16x32xf32, #tpu.memory_space<vmem>>, %arg3: memref<1024x32xbf16, #tpu.memory_space<vmem>>, %arg4: memref<1024x32xbf16, #tpu.memory_space<vmem>>, %arg5: memref<2x32xf32, #tpu.memory_space<vmem>>, %arg6: memref<32x1024xf32, #tpu.memory_space<vmem>>, %arg7: memref<1x1024xf32, #tpu.memory_space<vmem>>, %arg8: memref<2x16xf32, #tpu.memory_space<vmem>>, %arg9: memref<16x32xf32, #tpu.memory_space<vmem>>, %arg10: memref<16x32xf32, #tpu.memory_space<vmem>>, %arg11: memref<16x32xf32, #tpu.memory_space<vmem>>) attributes {dimension_semantics = [#tpu.dimension_semantics<parallel>], iteration_bounds = array<i64: 1>, scalar_prefetch = 0 : i64, scratch_operands = 0 : i64, tpu.core_type = #tpu.core_type<tc>, window_params = [{transform_indices = @transform_0, window_bounds = array<i64: 16, 1024>}, {transform_indices = @transform_1, window_bounds = array<i64: 16, 32>}, {pipeline_mode = #tpu.pipeline_mode<synchronous>, transform_indices = @transform_2, window_bounds = array<i64: 1024, 32>}, {pipeline_mode = #tpu.pipeline_mode<synchronous>, transform_indices = @transform_3, window_bounds = array<i64: 1024, 32>}, {pipeline_mode = #tpu.pipeline_mode<synchronous>, transform_indices = @transform_4, window_bounds = array<i64: 2, 32>}, {pipeline_mode = #tpu.pipeline_mode<synchronous>, transform_indices = @transform_5, window_bounds = array<i64: 32, 1024>}, {pipeline_mode = #tpu.pipeline_mode<synchronous>, transform_indices = @transform_6, window_bounds = array<i64: 1, 1024>}, {transform_indices = @transform_7, window_bounds = array<i64: 2, 16>}, {transform_indices = @transform_8, window_bounds = array<i64: 16, 32>}, {transform_indices = @transform_9, window_bounds = array<i64: 16, 32>}, {transform_indices = @transform_10, window_bounds = array<i64: 16, 32>}]} {
    %c0 = arith.constant 0 : index
    %c0_0 = arith.constant 0 : index
    %0 = vector.load %arg1[%c0, %c0_0] : memref<16x1024xbf16, #tpu.memory_space<vmem>>, vector<16x1024xbf16>
    %1 = arith.extf %0 : vector<16x1024xbf16> to vector<16x1024xf32>
    %c0_1 = arith.constant 0 : index
    %c0_2 = arith.constant 0 : index
    %2 = vector.load %arg3[%c0_1, %c0_2] : memref<1024x32xbf16, #tpu.memory_space<vmem>>, vector<1024x32xbf16>
    %cst = arith.constant dense<0.000000e+00> : vector<16x32xf32>
    %3 = tpu.matmul %0, %2, %cst {dimension_numbers = #tpu.dot_dimension_numbers<[1], [0], [0], [1], [0, 0, 1, 1], [], []>} : vector<16x1024xbf16>, vector<1024x32xbf16>, vector<16x32xf32> -> vector<16x32xf32>
    %c0_3 = arith.constant 0 : index
    %c0_4 = arith.constant 0 : index
    %4 = vector.load %arg5[%c0_3, %c0_4] : memref<2x32xf32, #tpu.memory_space<vmem>>, vector<1x32xf32>
    %5 = vector.broadcast %4 : vector<1x32xf32> to vector<16x32xf32>
    %6 = arith.addf %3, %5 : vector<16x32xf32>
    %c0_5 = arith.constant 0 : index
    %c0_6 = arith.constant 0 : index
    %7 = vector.load %arg4[%c0_5, %c0_6] : memref<1024x32xbf16, #tpu.memory_space<vmem>>, vector<1024x32xbf16>
    %cst_7 = arith.constant dense<0.000000e+00> : vector<16x32xf32>
    %8 = tpu.matmul %0, %7, %cst_7 {dimension_numbers = #tpu.dot_dimension_numbers<[1], [0], [0], [1], [0, 0, 1, 1], [], []>} : vector<16x1024xbf16>, vector<1024x32xbf16>, vector<16x32xf32> -> vector<16x32xf32>
    %c1 = arith.constant 1 : index
    %c0_8 = arith.constant 0 : index
    %9 = vector.load %arg5[%c1, %c0_8] : memref<2x32xf32, #tpu.memory_space<vmem>>, vector<1x32xf32>
    %10 = vector.broadcast %9 : vector<1x32xf32> to vector<16x32xf32>
    %11 = arith.addf %8, %10 : vector<16x32xf32>
    %12 = math.exp %11 : vector<16x32xf32>
    %c0_9 = arith.constant 0 : index
    %c0_10 = arith.constant 0 : index
    %13 = vector.load %arg2[%c0_9, %c0_10] : memref<16x32xf32, #tpu.memory_space<vmem>>, vector<16x32xf32>
    %14 = arith.mulf %12, %13 : vector<16x32xf32>
    %15 = arith.addf %6, %14 : vector<16x32xf32>
    %c0_11 = arith.constant 0 : index
    %c0_12 = arith.constant 0 : index
    %16 = vector.load %arg6[%c0_11, %c0_12] : memref<32x1024xf32, #tpu.memory_space<vmem>>, vector<32x1024xf32>
    %cst_13 = arith.constant dense<0.000000e+00> : vector<16x1024xf32>
    %17 = tpu.matmul %15, %16, %cst_13 {dimension_numbers = #tpu.dot_dimension_numbers<[1], [0], [0], [1], [0, 0, 1, 1], [], []>} : vector<16x32xf32>, vector<32x1024xf32>, vector<16x1024xf32> -> vector<16x1024xf32>
    %c0_14 = arith.constant 0 : index
    %c0_15 = arith.constant 0 : index
    %18 = vector.load %arg7[%c0_14, %c0_15] : memref<1x1024xf32, #tpu.memory_space<vmem>>, vector<1x1024xf32>
    %19 = vector.broadcast %18 : vector<1x1024xf32> to vector<16x1024xf32>
    %20 = arith.addf %17, %19 : vector<16x1024xf32>
    %21 = arith.mulf %1, %20 : vector<16x1024xf32>
    %cst_16 = arith.constant 0.000000e+00 : f32
    %22 = vector.broadcast %cst_16 : f32 to vector<16x1024xf32>
    %23 = arith.maximumf %20, %22 : vector<16x1024xf32>
    %24 = vector.broadcast %cst_16 : f32 to vector<16x1024xf32>
    %25 = arith.subf %20, %24 : vector<16x1024xf32>
    %26 = arith.cmpf one, %25, %25 : vector<16x1024xf32>
    %27 = vector.broadcast %cst_16 : f32 to vector<16x1024xf32>
    %28 = arith.addf %20, %27 : vector<16x1024xf32>
    %29 = math.absf %25 : vector<16x1024xf32>
    %cst_17 = arith.constant 0.000000e+00 : f32
    %30 = vector.broadcast %cst_17 : f32 to vector<16x1024xf32>
    %31 = arith.subf %30, %29 : vector<16x1024xf32>
    %32 = math.exp %31 : vector<16x1024xf32>
    %33 = math.log1p %32 : vector<16x1024xf32>
    %34 = arith.addf %23, %33 : vector<16x1024xf32>
    %35 = arith.select %26, %28, %34 : vector<16x1024xi1>, vector<16x1024xf32>
    %36 = arith.subf %21, %35 : vector<16x1024xf32>
    %cst_18 = arith.constant dense<0.000000e+00> : vector<16xf32>
    %37 = vector.multi_reduction <add>, %36, %cst_18 [1] : vector<16x1024xf32> to vector<16xf32>
    %cst_19 = arith.constant -5.000000e-01 : f32
    %38 = vector.broadcast %cst_19 : f32 to vector<16x32xf32>
    %39 = arith.mulf %38, %15 : vector<16x32xf32>
    %40 = arith.mulf %39, %15 : vector<16x32xf32>
    %cst_20 = arith.constant 0.918938517 : f32
    %41 = vector.broadcast %cst_20 : f32 to vector<16x32xf32>
    %42 = arith.subf %40, %41 : vector<16x32xf32>
    %cst_21 = arith.constant dense<0.000000e+00> : vector<16xf32>
    %43 = vector.multi_reduction <add>, %42, %cst_21 [1] : vector<16x32xf32> to vector<16xf32>
    %44 = arith.subf %15, %6 : vector<16x32xf32>
    %cst_22 = arith.constant 0.000000e+00 : f32
    %45 = vector.broadcast %cst_22 : f32 to vector<16x32xf32>
    %46 = arith.subf %45, %11 : vector<16x32xf32>
    %47 = math.exp %46 : vector<16x32xf32>
    %48 = arith.mulf %44, %47 : vector<16x32xf32>
    %cst_23 = arith.constant 0.000000e+00 : f32
    %49 = vector.broadcast %cst_23 : f32 to vector<16x32xf32>
    %50 = arith.subf %49, %11 : vector<16x32xf32>
    %cst_24 = arith.constant 0.918938517 : f32
    %51 = vector.broadcast %cst_24 : f32 to vector<16x32xf32>
    %52 = arith.subf %50, %51 : vector<16x32xf32>
    %cst_25 = arith.constant 5.000000e-01 : f32
    %53 = vector.broadcast %cst_25 : f32 to vector<16x32xf32>
    %54 = arith.mulf %53, %48 : vector<16x32xf32>
    %55 = arith.mulf %54, %48 : vector<16x32xf32>
    %56 = arith.subf %52, %55 : vector<16x32xf32>
    %cst_26 = arith.constant dense<0.000000e+00> : vector<16xf32>
    %57 = vector.multi_reduction <add>, %56, %cst_26 [1] : vector<16x32xf32> to vector<16xf32>
    %58 = arith.subf %57, %43 : vector<16xf32>
    %59 = vector.shape_cast %37 : vector<16xf32> to vector<1x16xf32>
    %c0_27 = arith.constant 0 : index
    %c0_28 = arith.constant 0 : index
    %60 = vector.load %arg8[%c0_27, %c0_28] : memref<2x16xf32, #tpu.memory_space<vmem>>, vector<1x16xf32>
    tpu.vector_store %arg8[%c0_27, %c0_28], %59 {strides = array<i32>} : memref<2x16xf32, #tpu.memory_space<vmem>>, vector<1x16xf32>,
    %61 = vector.shape_cast %58 : vector<16xf32> to vector<1x16xf32>
    %c1_29 = arith.constant 1 : index
    %c0_30 = arith.constant 0 : index
    %62 = vector.load %arg8[%c1_29, %c0_30] : memref<2x16xf32, #tpu.memory_space<vmem>>, vector<1x16xf32>
    tpu.vector_store %arg8[%c1_29, %c0_30], %61 {strides = array<i32>} : memref<2x16xf32, #tpu.memory_space<vmem>>, vector<1x16xf32>,
    %c0_31 = arith.constant 0 : index
    %c0_32 = arith.constant 0 : index
    %63 = vector.load %arg9[%c0_31, %c0_32] : memref<16x32xf32, #tpu.memory_space<vmem>>, vector<16x32xf32>
    tpu.vector_store %arg9[%c0_31, %c0_32], %15 {strides = array<i32>} : memref<16x32xf32, #tpu.memory_space<vmem>>, vector<16x32xf32>,
    %c0_33 = arith.constant 0 : index
    %c0_34 = arith.constant 0 : index
    %64 = vector.load %arg10[%c0_33, %c0_34] : memref<16x32xf32, #tpu.memory_space<vmem>>, vector<16x32xf32>
    tpu.vector_store %arg10[%c0_33, %c0_34], %6 {strides = array<i32>} : memref<16x32xf32, #tpu.memory_space<vmem>>, vector<16x32xf32>,
    %c0_35 = arith.constant 0 : index
    %c0_36 = arith.constant 0 : index
    %65 = vector.load %arg11[%c0_35, %c0_36] : memref<16x32xf32, #tpu.memory_space<vmem>>, vector<16x32xf32>
    tpu.vector_store %arg11[%c0_35, %c0_36], %11 {strides = array<i32>} : memref<16x32xf32, #tpu.memory_space<vmem>>, vector<16x32xf32>,
    return
  }
  func.func @transform_0(%arg0: i32) -> (i32, i32) {
    %c0_i32 = arith.constant 0 : i32
    %c0_i32_0 = arith.constant 0 : i32
    return %arg0, %c0_i32 : i32, i32
  }
  func.func @transform_1(%arg0: i32) -> (i32, i32) {
    %c0_i32 = arith.constant 0 : i32
    %c0_i32_0 = arith.constant 0 : i32
    return %arg0, %c0_i32 : i32, i32
  }
  func.func @transform_2(%arg0: i32) -> (i32, i32) {
    %c0_i32 = arith.constant 0 : i32
    %c0_i32_0 = arith.constant 0 : i32
    %c0_i32_1 = arith.constant 0 : i32
    return %c0_i32, %c0_i32_0 : i32, i32
  }
  func.func @transform_3(%arg0: i32) -> (i32, i32) {
    %c0_i32 = arith.constant 0 : i32
    %c0_i32_0 = arith.constant 0 : i32
    %c0_i32_1 = arith.constant 0 : i32
    return %c0_i32, %c0_i32_0 : i32, i32
  }
  func.func @transform_4(%arg0: i32) -> (i32, i32) {
    %c0_i32 = arith.constant 0 : i32
    %c0_i32_0 = arith.constant 0 : i32
    %c0_i32_1 = arith.constant 0 : i32
    return %c0_i32, %c0_i32_0 : i32, i32
  }
  func.func @transform_5(%arg0: i32) -> (i32, i32) {
    %c0_i32 = arith.constant 0 : i32
    %c0_i32_0 = arith.constant 0 : i32
    %c0_i32_1 = arith.constant 0 : i32
    return %c0_i32, %c0_i32_0 : i32, i32
  }
  func.func @transform_6(%arg0: i32) -> (i32, i32) {
    %c0_i32 = arith.constant 0 : i32
    %c0_i32_0 = arith.constant 0 : i32
    %c0_i32_1 = arith.constant 0 : i32
    return %c0_i32, %c0_i32_0 : i32, i32
  }
  func.func @transform_7(%arg0: i32) -> (i32, i32) {
    %c0_i32 = arith.constant 0 : i32
    %c0_i32_0 = arith.constant 0 : i32
    return %c0_i32, %arg0 : i32, i32
  }
  func.func @transform_8(%arg0: i32) -> (i32, i32) {
    %c0_i32 = arith.constant 0 : i32
    %c0_i32_0 = arith.constant 0 : i32
    return %arg0, %c0_i32 : i32, i32
  }
  func.func @transform_9(%arg0: i32) -> (i32, i32) {
    %c0_i32 = arith.constant 0 : i32
    %c0_i32_0 = arith.constant 0 : i32
    return %arg0, %c0_i32 : i32, i32
  }
  func.func @transform_10(%arg0: i32) -> (i32, i32) {
    %c0_i32 = arith.constant 0 : i32
    %c0_i32_0 = arith.constant 0 : i32
    return %arg0, %c0_i32 : i32, i32
  }
}

</mosaic_0001>

<bundles_post_ra>
// kernel: tpu_custom_call.1
= control target key start
LH: loop header
LB: loop body
LE: loop exit
PB: predicated region body
PF: predicated region fallthrough
CT: control target
= control target key end

     0   :  { %16 = vsyncpa [#allocation3], 0  ;;  %s4264_s0 = inlined_call_operand.vmem [shape: bf16[16,1024], index: 0, kind: input, shape index: {}]   ;;  %s4265_s1 = inlined_call_operand.vmem [shape: f32[16,32], index: 1, kind: input, shape index: {}]   ;;  %s4266_s2 = inlined_call_operand.vmem [shape: bf16[1024,32], index: 2, kind: input, shape index: {}]   ;;  %s4267_s3 = inlined_call_operand.vmem [shape: bf16[1024,32], index: 3, kind: input, shape index: {}]   ;;  %s4268_s4 = inlined_call_operand.vmem [shape: f32[2,32], index: 4, kind: input, shape index: {}]   ;;  %s4269_s5 = inlined_call_operand.vmem [shape: f32[32,1024], index: 5, kind: input, shape index: {}]   ;;  %s4270_s6 = inlined_call_operand.vmem [shape: f32[1,1024], index: 6, kind: input, shape index: {}]   ;;  %s4271_s7 = inlined_call_operand.hbm [shape: f32[2,16], index: 7, kind: output, shape index: {0}]   ;;  %s4272_s8 = inlined_call_operand.hbm [shape: f32[16,32], index: 8, kind: output, shape index: {1}]   ;;  %s4273_s9 = inlined_call_operand.hbm [shape: f32[16,32], index: 9, kind: output, shape index: {2}]   ;;  %s4274_s10 = inlined_call_operand.hbm [shape: f32[16,32], index: 10, kind: output, shape index: {3}]  }
   0x1   :  { %17 = vsyncpa [#allocation5], 0  ;;  %v2698_v0 = vld [vmem:[%s4266_s2 + $0x40] sm:$0xff]   ;;  %v2702_v4 = vld [vmem:[%s4266_s2 + $0x48] sm:$0xff]  }
   0x2   :  { %v2699_v1 = vld [vmem:[%s4266_s2 + $0xc0] sm:$0xff]   ;;  %2483 = vmatprep.subr.bf16.mxu0 %v2698_v0  ;;  %v2703_v5 = vld [vmem:[%s4266_s2 + $0xc8] sm:$0xff]   ;;  %v2706_v8 = vld [vmem:[%s4266_s2 + $0x50] sm:$0xff]  }
   0x3   :  { %v2700_v2 = vld [vmem:[%s4266_s2] sm:$0xff]   ;;  %2505 = vmatprep.subr.bf16.mxu1 %v2699_v1  ;;  %v2704_v6 = vld [vmem:[%s4266_s2 + $0x8] sm:$0xff]   ;;  %v2707_v9 = vld [vmem:[%s4266_s2 + $0xd0] sm:$0xff]  }
   0x4   :  { %v2701_v3 = vld [vmem:[%s4266_s2 + $0x80] sm:$0xff]   ;;  %2484 = vmatpush3.bf16.msra.mxu0 %v2700_v2  ;;  %v2705_v7 = vld [vmem:[%s4266_s2 + $0x88] sm:$0xff]   ;;  %v2708_v10 = vld [vmem:[%s4266_s2 + $0x10] sm:$0xff]  }
   0x5   :  { %2506 = vmatpush3.bf16.msra.mxu1 %v2701_v3  ;;  %2485 = vmatprep.subr.bf16.mxu0 %v2702_v4  ;;  %v2709_v11 = vld [vmem:[%s4266_s2 + $0x90] sm:$0xff]   ;;  %v2710_v12 = vld [vmem:[%s4266_s2 + $0x58] sm:$0xff]   ;;  %v2714_v16 = vld [vmem:[%s4266_s2 + $0x60] sm:$0xff]  }
   0x6   :  { %2507 = vmatprep.subr.bf16.mxu1 %v2703_v5  ;;  %v2711_v13 = vld [vmem:[%s4266_s2 + $0xd8] sm:$0xff]   ;;  %v2715_v17 = vld [vmem:[%s4266_s2 + $0xe0] sm:$0xff]   ;;  %v2718_v20 = vld [vmem:[%s4266_s2 + $0x68] sm:$0xff]  }
   0x7   :  { %v2712_v14 = vld [vmem:[%s4266_s2 + $0x18] sm:$0xff]   ;;  %v2716_v18 = vld [vmem:[%s4266_s2 + $0x20] sm:$0xff]   ;;  %v2719_v21 = vld [vmem:[%s4266_s2 + $0xe8] sm:$0xff]  }
   0x8   :  { %2486 = vmatpush3.bf16.msra.mxu0 %v2704_v6  ;;  %v2713_v15 = vld [vmem:[%s4266_s2 + $0x98] sm:$0xff]   ;;  %v2717_v19 = vld [vmem:[%s4266_s2 + $0xa0] sm:$0xff]   ;;  %v2720_v22 = vld [vmem:[%s4266_s2 + $0x28] sm:$0xff]  }
   0x9   :  { %2508 = vmatpush3.bf16.msra.mxu1 %v2705_v7  ;;  %2487 = vmatprep.subr.bf16.mxu0 %v2706_v8  ;;  %v2721_v23 = vld [vmem:[%s4266_s2 + $0xa8] sm:$0xff]   ;;  %v2722_v24 = vld [vmem:[%s4266_s2 + $0x70] sm:$0xff]   ;;  %v2726_v28 = vld [vmem:[%s4266_s2 + $0x78] sm:$0xff]  }
   0xa   :  { %2509 = vmatprep.subr.bf16.mxu1 %v2707_v9  ;;  %v2723_v25 = vld [vmem:[%s4266_s2 + $0xf0] sm:$0xff]   ;;  %v2727_v29 = vld [vmem:[%s4266_s2 + $0xf8] sm:$0xff]   ;;  %v34_v32 = vld [vmem:[%s4264_s0] sm:$0xff] }
   0xb   :  { %v2724_v26 = vld [vmem:[%s4266_s2 + $0x30] sm:$0xff]   ;;  %v2728_v30 = vld [vmem:[%s4266_s2 + $0x38] sm:$0xff]   ;;  %v38_v33 = vld [vmem:[%s4264_s0 + $0x20] sm:$0xff] }
   0xc   :  { %2488 = vmatpush3.bf16.msra.mxu0 %v2708_v10  ;;  %v2725_v27 = vld [vmem:[%s4266_s2 + $0xb0] sm:$0xff]   ;;  %v2729_v31 = vld [vmem:[%s4266_s2 + $0xb8] sm:$0xff]   ;;  %v35_v34 = vld [vmem:[%s4264_s0 + $0x8] sm:$0xff]  ;;  %v3170_v36 = vcombine.high %v34_v32, %v38_v33  ;;  %v3177_v39 = vcombine.low %v34_v32, %v38_v33 }
   0xd   :  { %2510 = vmatpush3.bf16.msra.mxu1 %v2709_v11  ;;  %2489 = vmatprep.subr.bf16.mxu0 %v2710_v12  ;;  %v39_v35 = vld [vmem:[%s4264_s0 + $0x28] sm:$0xff]  ;;  %v2730_v37 = vld [vmem:[%s4266_s2 + $0x140] sm:$0xff]   ;;  %v2738_v48 = vld [vmem:[%s4266_s2 + $0x150] sm:$0xff]  }
   0xe   :  { %2511 = vmatprep.subr.bf16.mxu1 %v2711_v13  ;;  %v3175_v38 = vcombine.high %v35_v34, %v39_v35  ;;  %v3179_v40 = vcombine.low %v35_v34, %v39_v35  ;;  %v2731_v41 = vld [vmem:[%s4266_s2 + $0x1c0] sm:$0xff]   ;;  %647 = vmatprep.mubr.bf16.mxu0 %v3170_v36  ;;  %v2734_v44 = vld [vmem:[%s4266_s2 + $0x148] sm:$0xff]   ;;  %v2739_v49 = vld [vmem:[%s4266_s2 + $0x1d0] sm:$0xff]  }
   0xf   :  { %v2732_v42 = vld [vmem:[%s4266_s2 + $0x100] sm:$0xff]   ;;  %v2735_v45 = vld [vmem:[%s4266_s2 + $0x1c8] sm:$0xff]   ;;  %v2740_v50 = vld [vmem:[%s4266_s2 + $0x110] sm:$0xff]  }
  0x10   :  { %2490 = vmatpush3.bf16.msra.mxu0 %v2712_v14  ;;  %688 = vmatprep.mubr.bf16.mxu1 %v3175_v38  ;;  %v2733_v43 = vld [vmem:[%s4266_s2 + $0x180] sm:$0xff]   ;;  %v2736_v46 = vld [vmem:[%s4266_s2 + $0x108] sm:$0xff]   ;;  %v2741_v51 = vld [vmem:[%s4266_s2 + $0x190] sm:$0xff]  }
  0x11   :  { %2512 = vmatpush3.bf16.msra.mxu1 %v2713_v15  ;;  %2491 = vmatprep.subr.bf16.mxu0 %v2714_v16  ;;  %v2737_v47 = vld [vmem:[%s4266_s2 + $0x188] sm:$0xff]   ;;  %v2742_v52 = vld [vmem:[%s4266_s2 + $0x158] sm:$0xff]   ;;  %v2746_v56 = vld [vmem:[%s4266_s2 + $0x160] sm:$0xff]  }
  0x12   :  { %2513 = vmatprep.subr.bf16.mxu1 %v2715_v17  ;;  %v2743_v53 = vld [vmem:[%s4266_s2 + $0x1d8] sm:$0xff]   ;;  %v2747_v57 = vld [vmem:[%s4266_s2 + $0x1e0] sm:$0xff]   ;;  %v2750_v60 = vld [vmem:[%s4266_s2 + $0x168] sm:$0xff]  }
  0x13   :  { %v2744_v54 = vld [vmem:[%s4266_s2 + $0x118] sm:$0xff]   ;;  %v2748_v58 = vld [vmem:[%s4266_s2 + $0x120] sm:$0xff]   ;;  %v2751_v61 = vld [vmem:[%s4266_s2 + $0x1e8] sm:$0xff]  }
  0x14   :  { %2492 = vmatpush3.bf16.msra.mxu0 %v2716_v18  ;;  %v2745_v55 = vld [vmem:[%s4266_s2 + $0x198] sm:$0xff]   ;;  %v2749_v59 = vld [vmem:[%s4266_s2 + $0x1a0] sm:$0xff]   ;;  %v2752_v62 = vld [vmem:[%s4266_s2 + $0x128] sm:$0xff]  }
  0x15   :  { %2514 = vmatpush3.bf16.msra.mxu1 %v2717_v19  ;;  %2493 = vmatprep.subr.bf16.mxu0 %v2718_v20  ;;  %v2753_v63 = vld [vmem:[%s4266_s2 + $0x1a8] sm:$0xff]   ;;  %v2754_v0 = vld [vmem:[%s4266_s2 + $0x170] sm:$0xff]   ;;  %v2758_v4 = vld [vmem:[%s4266_s2 + $0x178] sm:$0xff]  }
  0x16   :  { %2515 = vmatprep.subr.bf16.mxu1 %v2719_v21  ;;  %v2755_v1 = vld [vmem:[%s4266_s2 + $0x1f0] sm:$0xff]   ;;  %v2759_v5 = vld [vmem:[%s4266_s2 + $0x1f8] sm:$0xff]   ;;  %v2762_v16 = vld [vmem:[%s4267_s3 + $0x40] sm:$0xff]  }
  0x17   :  { %v2756_v2 = vld [vmem:[%s4266_s2 + $0x130] sm:$0xff]   ;;  %v2760_v6 = vld [vmem:[%s4266_s2 + $0x138] sm:$0xff]   ;;  %v2763_v17 = vld [vmem:[%s4267_s3 + $0xc0] sm:$0xff]  }
  0x18   :  { %2494 = vmatpush3.bf16.msra.mxu0 %v2720_v22  ;;  %v2757_v3 = vld [vmem:[%s4266_s2 + $0x1b0] sm:$0xff]   ;;  %v2761_v7 = vld [vmem:[%s4266_s2 + $0x1b8] sm:$0xff]   ;;  %v2764_v18 = vld [vmem:[%s4267_s3] sm:$0xff]  }
  0x19   :  { %2516 = vmatpush3.bf16.msra.mxu1 %v2721_v23  ;;  %2495 = vmatprep.subr.bf16.mxu0 %v2722_v24  ;;  %v36_v8 = vld [vmem:[%s4264_s0 + $0x10] sm:$0xff]  ;;  %v37_v11 = vld [vmem:[%s4264_s0 + $0x18] sm:$0xff]  ;;  %v2765_v19 = vld [vmem:[%s4267_s3 + $0x80] sm:$0xff]  }
  0x1a   :  { %2517 = vmatprep.subr.bf16.mxu1 %v2723_v25  ;;  %v40_v9 = vld [vmem:[%s4264_s0 + $0x30] sm:$0xff]  ;;  %v41_v12 = vld [vmem:[%s4264_s0 + $0x38] sm:$0xff]  ;;  %v2766_v20 = vld [vmem:[%s4267_s3 + $0x48] sm:$0xff]  }
  0x1b   :  { %v3284_v10 = vcombine.high %v36_v8, %v40_v9  ;;  %v3292_v13 = vcombine.low %v36_v8, %v40_v9  ;;  %v3294_v14 = vcombine.high %v37_v11, %v41_v12  ;;  %v3296_v15 = vcombine.low %v37_v11, %v41_v12  ;;  %v2767_v21 = vld [vmem:[%s4267_s3 + $0xc8] sm:$0xff]   ;;  %v2770_v24 = vld [vmem:[%s4267_s3 + $0x50] sm:$0xff]   ;;  %v2778_v32 = vld [vmem:[%s4267_s3 + $0x60] sm:$0xff]  }
  0x1c   :  { %2496 = vmatpush3.bf16.msra.mxu0 %v2724_v26  ;;  %v2768_v22 = vld [vmem:[%s4267_s3 + $0x8] sm:$0xff]   ;;  %v2771_v25 = vld [vmem:[%s4267_s3 + $0xd0] sm:$0xff]   ;;  %v2779_v33 = vld [vmem:[%s4267_s3 + $0xe0] sm:$0xff]  }
  0x1d   :  { %2518 = vmatpush3.bf16.msra.mxu1 %v2725_v27  ;;  %2497 = vmatprep.subr.bf16.mxu0 %v2726_v28  ;;  %v2769_v23 = vld [vmem:[%s4267_s3 + $0x88] sm:$0xff]   ;;  %v2772_v26 = vld [vmem:[%s4267_s3 + $0x10] sm:$0xff]   ;;  %v2774_v28 = vld [vmem:[%s4267_s3 + $0x58] sm:$0xff]  }
  0x1e   :  { %2519 = vmatprep.subr.bf16.mxu1 %v2727_v29  ;;  %v2773_v27 = vld [vmem:[%s4267_s3 + $0x90] sm:$0xff]   ;;  %v2775_v29 = vld [vmem:[%s4267_s3 + $0xd8] sm:$0xff]   ;;  %v2780_v34 = vld [vmem:[%s4267_s3 + $0x20] sm:$0xff]  }
  0x1f   :  { %v2781_v35 = vld [vmem:[%s4267_s3 + $0xa0] sm:$0xff]   ;;  %v2818_v8 = vld [vmem:[%s4267_s3 + $0x170] sm:$0xff]   ;;  %v2822_v12 = vld [vmem:[%s4267_s3 + $0x178] sm:$0xff]  }
  0x20   :  { %2498 = vmatpush3.bf16.msra.mxu0 %v2728_v30  ;;  %v2776_v30 = vld [vmem:[%s4267_s3 + $0x18] sm:$0xff]   ;;  %v2819_v9 = vld [vmem:[%s4267_s3 + $0x1f0] sm:$0xff]  }
  0x21   :  { %2520 = vmatpush3.bf16.msra.mxu1 %v2729_v31  ;;  %2527 = vmatprep.subr.bf16.mxu0 %v2730_v37  ;;  %v2777_v31 = vld [vmem:[%s4267_s3 + $0x98] sm:$0xff]   ;;  %v2783_v37 = vld [vmem:[%s4267_s3 + $0xe8] sm:$0xff]   ;;  %v2821_v11 = vld [vmem:[%s4267_s3 + $0x1b0] sm:$0xff]  }
  0x22   :  { %2549 = vmatprep.subr.bf16.mxu1 %v2731_v41  ;;  %v2785_v41 = vld [vmem:[%s4267_s3 + $0xa8] sm:$0xff]  }
  0x23   :  { %648 = vmatmul.mubr.bf16.vlgmr.msra.gmra.mrb[0].mxu0 %v3177_v39 }
  0x24   :  { %689 = vmatmul.mubr.bf16.vlgmr.msra.gmra.mrb[0].mxu1 %v3179_v40  ;;  %2528 = vmatpush3.bf16.msra.mxu0 %v2732_v42  ;;  %v2786_v42 = vld [vmem:[%s4267_s3 + $0x70] sm:$0xff]  }
  0x25   :  { %2550 = vmatpush3.bf16.msra.mxu1 %v2733_v43  ;;  %2529 = vmatprep.subr.bf16.mxu0 %v2734_v44  ;;  %v2787_v43 = vld [vmem:[%s4267_s3 + $0xf0] sm:$0xff]  }
  0x26   :  { %2551 = vmatprep.subr.bf16.mxu1 %v2735_v45  ;;  %729 = vmatprep.mubr.bf16.mxu0 %v3284_v10  ;;  %v2788_v44 = vld [vmem:[%s4267_s3 + $0x30] sm:$0xff]  }
  0x27   :  { %770 = vmatprep.mubr.bf16.mxu1 %v3294_v14  ;;  %v2789_v45 = vld [vmem:[%s4267_s3 + $0xb0] sm:$0xff]  }
  0x28   :  { %2530 = vmatpush3.bf16.msra.mxu0 %v2736_v46  ;;  %v2790_v46 = vld [vmem:[%s4267_s3 + $0x78] sm:$0xff]  }
  0x29   :  { %2552 = vmatpush3.bf16.msra.mxu1 %v2737_v47  ;;  %2531 = vmatprep.subr.bf16.mxu0 %v2738_v48  ;;  %v2791_v47 = vld [vmem:[%s4267_s3 + $0xf8] sm:$0xff]  }
  0x2a   :  { %2553 = vmatprep.subr.bf16.mxu1 %v2739_v49  ;;  %v2792_v48 = vld [vmem:[%s4267_s3 + $0x38] sm:$0xff]  }
  0x2b   :  { %v2793_v49 = vld [vmem:[%s4267_s3 + $0xb8] sm:$0xff]  }
  0x2c   :  { %2532 = vmatpush3.bf16.msra.mxu0 %v2740_v50  ;;  %v2794_v50 = vld [vmem:[%s4267_s3 + $0x140] sm:$0xff]  }
  0x2d   :  { %2554 = vmatpush3.bf16.msra.mxu1 %v2741_v51  ;;  %2533 = vmatprep.subr.bf16.mxu0 %v2742_v52  ;;  %v2795_v51 = vld [vmem:[%s4267_s3 + $0x1c0] sm:$0xff]  }
  0x2e   :  { %2555 = vmatprep.subr.bf16.mxu1 %v2743_v53  ;;  %v2796_v52 = vld [vmem:[%s4267_s3 + $0x100] sm:$0xff]  }
  0x2f   :  { %v2797_v53 = vld [vmem:[%s4267_s3 + $0x180] sm:$0xff]  }
  0x30   :  { %2534 = vmatpush3.bf16.msra.mxu0 %v2744_v54  ;;  %v2798_v54 = vld [vmem:[%s4267_s3 + $0x148] sm:$0xff]  }
  0x31   :  { %2556 = vmatpush3.bf16.msra.mxu1 %v2745_v55  ;;  %2535 = vmatprep.subr.bf16.mxu0 %v2746_v56  ;;  %v2799_v55 = vld [vmem:[%s4267_s3 + $0x1c8] sm:$0xff]   ;;  %v2802_v56 = vld [vmem:[%s4267_s3 + $0x150] sm:$0xff]  }
  0x32   :  { %2557 = vmatprep.subr.bf16.mxu1 %v2747_v57  ;;  %v2803_v57 = vld [vmem:[%s4267_s3 + $0x1d0] sm:$0xff]  }
  0x34   :  { %2536 = vmatpush3.bf16.msra.mxu0 %v2748_v58  ;;  %v2804_v58 = vld [vmem:[%s4267_s3 + $0x110] sm:$0xff]  }
  0x35   :  { %2558 = vmatpush3.bf16.msra.mxu1 %v2749_v59  ;;  %2537 = vmatprep.subr.bf16.mxu0 %v2750_v60  ;;  %v2805_v59 = vld [vmem:[%s4267_s3 + $0x190] sm:$0xff]   ;;  %v2806_v60 = vld [vmem:[%s4267_s3 + $0x158] sm:$0xff]  }
  0x36   :  { %2559 = vmatprep.subr.bf16.mxu1 %v2751_v61  ;;  %v2807_v61 = vld [vmem:[%s4267_s3 + $0x1d8] sm:$0xff]  }
  0x38   :  { %2538 = vmatpush3.bf16.msra.mxu0 %v2752_v62  ;;  %v2808_v62 = vld [vmem:[%s4267_s3 + $0x118] sm:$0xff]  }
  0x39   :  { %2560 = vmatpush3.bf16.msra.mxu1 %v2753_v63  ;;  %2539 = vmatprep.subr.bf16.mxu0 %v2754_v0  ;;  %v2809_v63 = vld [vmem:[%s4267_s3 + $0x198] sm:$0xff]   ;;  %v2810_v0 = vld [vmem:[%s4267_s3 + $0x160] sm:$0xff]  }
  0x3a   :  { %2561 = vmatprep.subr.bf16.mxu1 %v2755_v1  ;;  %v2811_v1 = vld [vmem:[%s4267_s3 + $0x1e0] sm:$0xff]  }
  0x3c   :  { %2540 = vmatpush3.bf16.msra.mxu0 %v2756_v2  ;;  %v2812_v2 = vld [vmem:[%s4267_s3 + $0x120] sm:$0xff]  }
  0x3d   :  { %2562 = vmatpush3.bf16.msra.mxu1 %v2757_v3  ;;  %2541 = vmatprep.subr.bf16.mxu0 %v2758_v4  ;;  %v2813_v3 = vld [vmem:[%s4267_s3 + $0x1a0] sm:$0xff]   ;;  %v2814_v4 = vld [vmem:[%s4267_s3 + $0x168] sm:$0xff]  }
  0x3e   :  { %2563 = vmatprep.subr.bf16.mxu1 %v2759_v5  ;;  %v2815_v5 = vld [vmem:[%s4267_s3 + $0x1e8] sm:$0xff]  }
  0x40   :  { %2542 = vmatpush3.bf16.msra.mxu0 %v2760_v6  ;;  %v2816_v6 = vld [vmem:[%s4267_s3 + $0x128] sm:$0xff]  }
  0x41   :  { %2564 = vmatpush3.bf16.msra.mxu1 %v2761_v7  ;;  %2571 = vmatprep.subr.bf16.mxu0 %v2762_v16  ;;  %v2817_v7 = vld [vmem:[%s4267_s3 + $0x1a8] sm:$0xff]   ;;  %v2824_v16 = vld [vmem:[%s4267_s3 + $0x138] sm:$0xff]  }
  0x42   :  { %2593 = vmatprep.subr.bf16.mxu1 %v2763_v17  ;;  %v2825_v17 = vld [vmem:[%s4267_s3 + $0x1b8] sm:$0xff]  }
  0x43   :  { %730 = vmatmul.mubr.bf16.vlgmr.msra.gmra.mrb[4].mxu0 %v3292_v13 }
  0x44   :  { %771 = vmatmul.mubr.bf16.vlgmr.msra.gmra.mrb[4].mxu1 %v3296_v15  ;;  %2572 = vmatpush3.bf16.msra.mxu0 %v2764_v18 }
  0x45   :  { %2594 = vmatpush3.bf16.msra.mxu1 %v2765_v19  ;;  %1328 = vmatprep.mubr.bf16.mxu0 %v3170_v36  ;;  %v2782_v36 = vld [vmem:[%s4267_s3 + $0x68] sm:$0xff]  }
  0x46   :  { %2573 = vmatprep.subr.bf16.mxu0 %v2766_v20  ;;  %1369 = vmatprep.mubr.bf16.mxu1 %v3175_v38  ;;  %v2784_v38 = vld [vmem:[%s4267_s3 + $0x28] sm:$0xff]  }
  0x47   :  { %2595 = vmatprep.subr.bf16.mxu1 %v2767_v21 }
  0x48   :  { %2574 = vmatpush3.bf16.msra.mxu0 %v2768_v22 }
  0x49   :  { %2596 = vmatpush3.bf16.msra.mxu1 %v2769_v23  ;;  %2575 = vmatprep.subr.bf16.mxu0 %v2770_v24 }
  0x4a   :  { %2597 = vmatprep.subr.bf16.mxu1 %v2771_v25 }
  0x4c   :  { %2576 = vmatpush3.bf16.msra.mxu0 %v2772_v26 }
  0x4d   :  { %2598 = vmatpush3.bf16.msra.mxu1 %v2773_v27  ;;  %2577 = vmatprep.subr.bf16.mxu0 %v2774_v28 }
  0x4e   :  { %2599 = vmatprep.subr.bf16.mxu1 %v2775_v29 }
  0x50   :  { %2578 = vmatpush3.bf16.msra.mxu0 %v2776_v30 }
  0x51   :  { %2600 = vmatpush3.bf16.msra.mxu1 %v2777_v31  ;;  %2579 = vmatprep.subr.bf16.mxu0 %v2778_v32 }
  0x52   :  { %2601 = vmatprep.subr.bf16.mxu1 %v2779_v33 }
  0x54   :  { %2580 = vmatpush3.bf16.msra.mxu0 %v2780_v34 }
  0x55   :  { %2602 = vmatpush3.bf16.msra.mxu1 %v2781_v35  ;;  %2581 = vmatprep.subr.bf16.mxu0 %v2782_v36 }
  0x56   :  { %2603 = vmatprep.subr.bf16.mxu1 %v2783_v37 }
  0x58   :  { %2582 = vmatpush3.bf16.msra.mxu0 %v2784_v38 }
  0x59   :  { %2604 = vmatpush3.bf16.msra.mxu1 %v2785_v41  ;;  %2583 = vmatprep.subr.bf16.mxu0 %v2786_v42 }
  0x5a   :  { %2605 = vmatprep.subr.bf16.mxu1 %v2787_v43 }
  0x5c   :  { %2584 = vmatpush3.bf16.msra.mxu0 %v2788_v44 }
  0x5d   :  { %2606 = vmatpush3.bf16.msra.mxu1 %v2789_v45  ;;  %2585 = vmatprep.subr.bf16.mxu0 %v2790_v46 }
  0x5e   :  { %2607 = vmatprep.subr.bf16.mxu1 %v2791_v47 }
  0x60   :  { %2586 = vmatpush3.bf16.msra.mxu0 %v2792_v48 }
  0x61   :  { %2608 = vmatpush3.bf16.msra.mxu1 %v2793_v49  ;;  %2615 = vmatprep.subr.bf16.mxu0 %v2794_v50 }
  0x62   :  { %2637 = vmatprep.subr.bf16.mxu1 %v2795_v51 }
  0x63   :  { %1329 = vmatmul.mubr.bf16.vlgmr.msra.gmra.mrb[8].mxu0 %v3177_v39  ;;  %v2800_v39 = vld [vmem:[%s4267_s3 + $0x108] sm:$0xff]  }
  0x64   :  { %1370 = vmatmul.mubr.bf16.vlgmr.msra.gmra.mrb[8].mxu1 %v3179_v40  ;;  %2616 = vmatpush3.bf16.msra.mxu0 %v2796_v52  ;;  %v2801_v40 = vld [vmem:[%s4267_s3 + $0x188] sm:$0xff]  }
  0x65   :  { %2638 = vmatpush3.bf16.msra.mxu1 %v2797_v53  ;;  %1410 = vmatprep.mubr.bf16.mxu0 %v3284_v10  ;;  %v2820_v10 = vld [vmem:[%s4267_s3 + $0x130] sm:$0xff]  }
  0x66   :  { %2617 = vmatprep.subr.bf16.mxu0 %v2798_v54  ;;  %1451 = vmatprep.mubr.bf16.mxu1 %v3294_v14  ;;  %v2823_v14 = vld [vmem:[%s4267_s3 + $0x1f8] sm:$0xff]  }
  0x67   :  { %2639 = vmatprep.subr.bf16.mxu1 %v2799_v55 }
  0x68   :  { %2618 = vmatpush3.bf16.msra.mxu0 %v2800_v39 }
  0x69   :  { %2640 = vmatpush3.bf16.msra.mxu1 %v2801_v40  ;;  %2619 = vmatprep.subr.bf16.mxu0 %v2802_v56 }
  0x6a   :  { %2641 = vmatprep.subr.bf16.mxu1 %v2803_v57 }
  0x6c   :  { %2620 = vmatpush3.bf16.msra.mxu0 %v2804_v58 }
  0x6d   :  { %2642 = vmatpush3.bf16.msra.mxu1 %v2805_v59  ;;  %2621 = vmatprep.subr.bf16.mxu0 %v2806_v60 }
  0x6e   :  { %2643 = vmatprep.subr.bf16.mxu1 %v2807_v61 }
  0x70   :  { %2622 = vmatpush3.bf16.msra.mxu0 %v2808_v62 }
  0x71   :  { %2644 = vmatpush3.bf16.msra.mxu1 %v2809_v63  ;;  %2623 = vmatprep.subr.bf16.mxu0 %v2810_v0 }
  0x72   :  { %2645 = vmatprep.subr.bf16.mxu1 %v2811_v1 }
  0x74   :  { %2624 = vmatpush3.bf16.msra.mxu0 %v2812_v2 }
  0x75   :  { %2646 = vmatpush3.bf16.msra.mxu1 %v2813_v3  ;;  %2625 = vmatprep.subr.bf16.mxu0 %v2814_v4 }
  0x76   :  { %2647 = vmatprep.subr.bf16.mxu1 %v2815_v5 }
  0x78   :  { %2626 = vmatpush3.bf16.msra.mxu0 %v2816_v6 }
  0x79   :  { %2648 = vmatpush3.bf16.msra.mxu1 %v2817_v7  ;;  %2627 = vmatprep.subr.bf16.mxu0 %v2818_v8 }
  0x7a   :  { %2649 = vmatprep.subr.bf16.mxu1 %v2819_v9 }
  0x7c   :  { %2628 = vmatpush3.bf16.msra.mxu0 %v2820_v10 }
  0x7d   :  { %2650 = vmatpush3.bf16.msra.mxu1 %v2821_v11  ;;  %2629 = vmatprep.subr.bf16.mxu0 %v2822_v12 }
  0x7e   :  { %2651 = vmatprep.subr.bf16.mxu1 %v2823_v14 }
  0x80   :  { %2630 = vmatpush3.bf16.msra.mxu0 %v2824_v16 }
  0x81   :  { %18 = vsyncpa [#allocation8], 0  ;;  %2652 = vmatpush3.bf16.msra.mxu1 %v2825_v17  ;;  %v1471_v18 = vld [vmem:[%s4269_s5 + $0x8] sm:$0xff]  ;;  %v1473_v20 = vld [vmem:[%s4269_s5 + $0x18] sm:$0xff]  ;;  %v3000_v46 = vmov 0.0   ;;  %vm1544_vm0 = vcmask 261120  }
  0x82   :  { %v1479_v19 = vld [vmem:[%s4269_s5 + $0x48] sm:$0xff]  ;;  %v1470_v22 = vld [vmem:[%s4269_s5] sm:$0xff]  ;;  %v1472_v25 = vld [vmem:[%s4269_s5 + $0x10] sm:$0xff]  ;;  %vm2248_vm1 = vcmask 130112   ;;  %vm2251_vm2 = vcmask 122880  }
  0x83   :  { %1411 = vmatmul.mubr.bf16.vlgmr.msra.gmra.mrb[12].mxu0 %v3292_v13  ;;  %v2659_v21 = vpack.c.bf16 %v1479_v19, %v1471_v18  ;;  %v1478_v13 = vld [vmem:[%s4269_s5 + $0x40] sm:$0xff]  ;;  %v1480_v26 = vld [vmem:[%s4269_s5 + $0x50] sm:$0xff]  ;;  %v1487_v28 = vld [vmem:[%s4269_s5 + $0x88] sm:$0xff] }
  0x84   :  { %1452 = vmatmul.mubr.bf16.vlgmr.msra.gmra.mrb[12].mxu1 %v3296_v15  ;;  %v1481_v15 = vld [vmem:[%s4269_s5 + $0x58] sm:$0xff]  ;;  %v2661_v23 = vpack.c.bf16 %v1478_v13, %v1470_v22  ;;  %v2669_v27 = vpack.c.bf16 %v1480_v26, %v1472_v25  ;;  %v1495_v29 = vld [vmem:[%s4269_s5 + $0xc8] sm:$0xff]  ;;  %v1486_v32 = vld [vmem:[%s4269_s5 + $0x80] sm:$0xff]  ;;  %1615 = vmatprep.mubr.f32.mxu0 %v3000_v46 }
  0x85   :  { %v2667_v24 = vpack.c.bf16 %v1481_v15, %v1473_v20  ;;  %2660 = vmatprep.subr.bf16.mxu0 %v2659_v21  ;;  %v1489_v30 = vld [vmem:[%s4269_s5 + $0x98] sm:$0xff]  ;;  %v2663_v31 = vpack.c.bf16 %v1495_v29, %v1487_v28  ;;  %v1494_v33 = vld [vmem:[%s4269_s5 + $0xc0] sm:$0xff]  ;;  %v1488_v37 = vld [vmem:[%s4269_s5 + $0x90] sm:$0xff]  ;;  %1692 = vmatprep.mubr.f32.mxu1 %v3000_v46 }
  0x86   :  { %2662 = vmatpush1.bf16.msra.mxu0 %v2661_v23  ;;  %v1497_v34 = vld [vmem:[%s4269_s5 + $0xd8] sm:$0xff]  ;;  %v2665_v35 = vpack.c.bf16 %v1494_v33, %v1486_v32  ;;  %v1496_v38 = vld [vmem:[%s4269_s5 + $0xd0] sm:$0xff]  ;;  %v1475_v42 = vld [vmem:[%s4269_s5 + $0x28] sm:$0xff] }
  0x87   :  { %2668 = vmatprep.subr.bf16.mxu1 %v2667_v24  ;;  %v2671_v36 = vpack.c.bf16 %v1497_v34, %v1489_v30  ;;  %2664 = vmatprep.subr.bf16.mxu0 %v2663_v31  ;;  %v2673_v41 = vpack.c.bf16 %v1496_v38, %v1488_v37  ;;  %v1483_v43 = vld [vmem:[%s4269_s5 + $0x68] sm:$0xff]  ;;  %v1477_v45 = vld [vmem:[%s4269_s5 + $0x38] sm:$0xff]  ;;  %v2333_v51 = vld [vmem:[%s4268_s4] ss:$0 sm:$0xff] }
  0x88   :  { %2670 = vmatpush1.bf16.msra.mxu1 %v2669_v27  ;;  %v2675_v44 = vpack.c.bf16 %v1483_v43, %v1475_v42  ;;  %v1485_v47 = vld [vmem:[%s4269_s5 + $0x78] sm:$0xff]  ;;  %v2406_v20 = vld [vmem:[%s4268_s4 + $0x1] ss:$0 sm:$0xff] }
  0x89   :  { %2672 = vmatprep.subr.bf16.mxu1 %v2671_v36  ;;  %v2683_v48 = vpack.c.bf16 %v1485_v47, %v1477_v45 }
  0x8a   :  { %2666 = vmatpush1.bf16.msra.mxu0 %v2665_v35 }
  0x8b   :  { %2676 = vmatprep.subr.bf16.mxu0 %v2675_v44 }
  0x8c   :  { %2674 = vmatpush1.bf16.msra.mxu1 %v2673_v41 }
  0x8d   :  { %2684 = vmatprep.subr.bf16.mxu1 %v2683_v48 }
  0xf6   :  { %v2499_v49 = vpop.f32.mrb[0].mxu0 }
  0xf7   :  { %v2521_v50 = vpop.f32.mrb[0].mxu1  ;;  %v2500_v52 = vpop.f32.mrb[1].mxu0 }
  0xf8   :  { %v2501_v53 = vadd.f32 %v2500_v52, %v2499_v49  ;;  %v2522_v54 = vpop.f32.mrb[1].mxu1  ;;  %v2502_v55 = vpop.f32.mrb[2].mxu0 }
  0xf9   :  { %v2523_v39 = vadd.f32 %v2522_v54, %v2521_v50  ;;  %v2524_v40 = vpop.f32.mrb[2].mxu1  ;;  %v2503_v56 = vpop.f32.mrb[3].mxu0 }
  0xfa   :  { %v650_v57 = vadd.f32 %v2501_v53, %v2333_v51  ;;  %v2504_v58 = vadd.f32 %v2503_v56, %v2502_v55  ;;  %v2525_v59 = vpop.f32.mrb[3].mxu1  ;;  %v1464_v56 = vld [vmem:[%s4265_s1] sm:$0xff] }
  0xfb   :  { %v2526_v60 = vadd.f32 %v2525_v59, %v2524_v40  ;;  %v1476_v59 = vld [vmem:[%s4269_s5 + $0x30] sm:$0xff] }
  0xfc   :  { %v691_v61 = vadd.f32 %v2523_v39, %v650_v57  ;;  %v653_v62 = vadd.f32 %v2504_v58, %v2333_v51  ;;  %v1474_v57 = vld [vmem:[%s4269_s5 + $0x20] sm:$0xff] }
  0xfd   :  { %v1482_v58 = vld [vmem:[%s4269_s5 + $0x60] sm:$0xff] }
  0xfe   :  { %v694_v63 = vadd.f32 %v2526_v60, %v653_v62  ;;  %v1484_v60 = vld [vmem:[%s4269_s5 + $0x70] sm:$0xff]  ;;  %v1465_v62 = vld [vmem:[%s4265_s1 + $0x8] sm:$0xff] }
 0x116   :  { %v2543_v0 = vpop.f32.mrb[4].mxu0 }
 0x117   :  { %v2565_v1 = vpop.f32.mrb[4].mxu1  ;;  %v2544_v2 = vpop.f32.mrb[5].mxu0 }
 0x118   :  { %v2566_v3 = vpop.f32.mrb[5].mxu1  ;;  %v2545_v4 = vadd.f32 %v2544_v2, %v2543_v0  ;;  %v2546_v6 = vpop.f32.mrb[6].mxu0  ;;  %v1493_v2 = vld [vmem:[%s4269_s5 + $0xb8] sm:$0xff] }
 0x119   :  { %v2567_v5 = vadd.f32 %v2566_v3, %v2565_v1  ;;  %v2568_v7 = vpop.f32.mrb[6].mxu1  ;;  %v2547_v8 = vpop.f32.mrb[7].mxu0  ;;  %v1499_v1 = vld [vmem:[%s4269_s5 + $0xe8] sm:$0xff]  ;;  %v1501_v3 = vld [vmem:[%s4269_s5 + $0xf8] sm:$0xff] }
 0x11a   :  { %v2569_v9 = vpop.f32.mrb[7].mxu1  ;;  %v732_v10 = vadd.f32 %v2545_v4, %v691_v61  ;;  %v2548_v11 = vadd.f32 %v2547_v8, %v2546_v6  ;;  %v2685_v6 = vpack.c.bf16 %v1484_v60, %v1476_v59  ;;  %v3677_v59 = vld [vmem:[%s4270_s6] sm:$0xff] }
 0x11b   :  { %v2570_v12 = vadd.f32 %v2569_v9, %v2568_v7  ;;  %v1490_v7 = vld [vmem:[%s4269_s5 + $0xa0] sm:$0xff] }
 0x11c   :  { %v3567_v14 = vadd.f32 %v2567_v5, %v732_v10  ;;  %v735_v16 = vadd.f32 %v2548_v11, %v694_v63  ;;  %v1491_v63 = vld [vmem:[%s4269_s5 + $0xa8] sm:$0xff]  ;;  %v2677_v5 = vpack.c.bf16 %v1482_v58, %v1474_v57  ;;  %v1498_v10 = vld [vmem:[%s4269_s5 + $0xe0] sm:$0xff]  ;;  %v1492_v11 = vld [vmem:[%s4269_s5 + $0xb0] sm:$0xff] }
 0x11e   :  { %2268 = vst.msk [vmem:[#allocation6] sm:$0xff] %vm1544_vm0, %v3567_v14  ;;  %v3571_v17 = vadd.f32 %v2570_v12, %v735_v16  ;;  %v1500_v12 = vld [vmem:[%s4269_s5 + $0xf0] sm:$0xff]  ;;  %v2679_v16 = vpack.c.bf16 %v1499_v1, %v1491_v63 }
 0x120   :  { %2269 = vst.msk [vmem:[#allocation6 + $0x8] sm:$0xff] %vm1544_vm0, %v3571_v17 }
 0x136   :  { %v2587_v18 = vpop.f32.mrb[8].mxu0 }
 0x137   :  { %v2609_v19 = vpop.f32.mrb[8].mxu1  ;;  %v2588_v21 = vpop.f32.mrb[9].mxu0 }
 0x138   :  { %v2589_v22 = vadd.f32 %v2588_v21, %v2587_v18  ;;  %v2610_v13 = vpop.f32.mrb[9].mxu1  ;;  %v2590_v15 = vpop.f32.mrb[10].mxu0  ;;  %v2687_v18 = vpack.c.bf16 %v1501_v3, %v1493_v2  ;;  %v2898_v2 = vld [vmem:[%s4264_s0] sm:$0xff] }
 0x139   :  { %v2611_v23 = vadd.f32 %v2610_v13, %v2609_v19  ;;  %v2612_v24 = vpop.f32.mrb[10].mxu1  ;;  %v2591_v25 = vpop.f32.mrb[11].mxu0  ;;  %v2681_v13 = vpack.c.bf16 %v1498_v10, %v1490_v7  ;;  %v42_v3 = vunpack.c.l.bf16 %v2898_v2 }
 0x13a   :  { %v1331_v26 = vadd.f32 %v2589_v22, %v2406_v20  ;;  %v2592_v27 = vadd.f32 %v2591_v25, %v2590_v15  ;;  %v2613_v28 = vpop.f32.mrb[11].mxu1  ;;  %v2689_v15 = vpack.c.bf16 %v1500_v12, %v1492_v11 }
 0x13b   :  { %v2614_v29 = vadd.f32 %v2613_v28, %v2612_v24 }
 0x13c   :  { %v1372_v30 = vadd.f32 %v2611_v23, %v1331_v26  ;;  %v1334_v31 = vadd.f32 %v2592_v27, %v2406_v20 }
 0x13e   :  { %v1375_v32 = vadd.f32 %v2614_v29, %v1334_v31 }
 0x156   :  { %v2631_v33 = vpop.f32.mrb[12].mxu0 }
 0x157   :  { %v2653_v34 = vpop.f32.mrb[12].mxu1  ;;  %v2632_v35 = vpop.f32.mrb[13].mxu0 }
 0x158   :  { %v2633_v36 = vadd.f32 %v2632_v35, %v2631_v33  ;;  %v2654_v37 = vpop.f32.mrb[13].mxu1  ;;  %v2634_v38 = vpop.f32.mrb[14].mxu0 }
 0x159   :  { %v2655_v41 = vadd.f32 %v2654_v37, %v2653_v34  ;;  %v2656_v42 = vpop.f32.mrb[14].mxu1  ;;  %v2635_v43 = vpop.f32.mrb[15].mxu0 }
 0x15a   :  { %v1413_v44 = vadd.f32 %v2633_v36, %v1372_v30  ;;  %v2636_v45 = vadd.f32 %v2635_v43, %v2634_v38  ;;  %v2657_v47 = vpop.f32.mrb[15].mxu1 }
 0x15b   :  { %v2658_v48 = vadd.f32 %v2657_v47, %v2656_v42 }
 0x15c   :  { %v3578_v49 = vadd.f32 %v2655_v41, %v1413_v44  ;;  %v1416_v50 = vadd.f32 %v2636_v45, %v1375_v32  ;;  %v1504_v44 = vlaneseq }
 0x15e   :  { %v1460_v51 = vmul.f32 1.442695, %v3578_v49  ;;  %2270 = vst.msk [vmem:[#allocation7] sm:$0xff] %vm1544_vm0, %v3578_v49  ;;  %v3583_v52 = vadd.f32 %v2658_v48, %v1416_v50  ;;  %v2211_v53 = vsub.f32 0.0, %v3578_v49  ;;  %v2238_v45 = vand.u32 127, %v1504_v44 }
 0x15f   :  { %v3660_v48 = vshrl.u32 %v1504_v44, 7 }
 0x160   :  { %2826 = vpow2.f32 %v1460_v51  ;;  %v1462_v54 = vmul.f32 1.442695, %v3583_v52  ;;  %2271 = vst.msk [vmem:[#allocation7 + $0x8] sm:$0xff] %vm1544_vm0, %v3583_v52  ;;  %v2212_v55 = vsub.f32 0.0, %v3583_v52  ;;  %v2213_v39 = vmul.f32 1.442695, %v2211_v53 }
 0x161   :  { %v2481_v31 = vadd.f32 -0.9189385, %v2211_v53  ;;  %v3663_v50 = vsub.s32 %v2238_v45, %v3660_v48  ;;  %v1506_v57 = vsub.s32 0, %v3660_v48  ;;  %v1514_v58 = vsub.s32 2, %v3660_v48 }
 0x162   :  { %2828 = vpow2.f32 %v1462_v54  ;;  %v2215_v40 = vmul.f32 1.442695, %v2212_v55  ;;  %v2482_v36 = vadd.f32 -0.9189385, %v2212_v55  ;;  %v1510_v60 = vsub.s32 1, %v3660_v48 }
 0x163   :  { %2830 = vpow2.f32 %v2213_v39  ;;  %4277 = vst [vmem:[#allocation12_spill] sm:$0xff] %v3663_v50  ;;  %v1515_v63 = vrot.slane %v3677_v59, %v1514_v58 }
 0x164   :  { %2832 = vpow2.f32 %v2215_v40 }
 0x16a   :  { %v2827_v61 = vpop.eup %2826 }
 0x16b   :  { %v1466_v0 = vmul.f32 %v2827_v61, %v1464_v56  ;;  %v1518_v61 = vsub.s32 3, %v3660_v48 }
 0x16c   :  { %v2829_v4 = vpop.eup %2828 }
 0x16d   :  { %v1468_v8 = vadd.f32 %v1466_v0, %v3567_v14  ;;  %v1467_v9 = vmul.f32 %v2829_v4, %v1465_v62  ;;  %v2831_v22 = vpop.eup %2830  ;;  %v1507_v62 = vrot.slane %v3677_v59, %v1506_v57  ;;  %v1511_v0 = vrot.slane %v3677_v59, %v1510_v60  ;;  %v2899_v4 = vld [vmem:[%s4264_s0 + $0x8] sm:$0xff] }
 0x16e   :  { %v2833_v27 = vpop.eup %2832  ;;  %v3685_v1 = vrot.slane %v3677_v59, %v1518_v61 }
 0x16f   :  { %2266 = vst.msk [vmem:[#allocation4] sm:$0xff] %vm1544_vm0, %v1468_v8  ;;  %v1469_v19 = vadd.f32 %v1467_v9, %v3571_v17  ;;  %2471 = vmatmul.mubr.msk.f32.vlgmr.msra.gmra.mrb[16].mxu0 %vm1544_vm0, %v1468_v8  ;;  %2473 = vmatmul.mubr.msk.f32.vlgmr.msra.gmra.mrb[16].mxu1 %vm1544_vm0, %v1468_v8  ;;  %v2197_v20 = vmul.f32 -0.5, %v1468_v8  ;;  %v2209_v21 = vsub.f32 %v1468_v8, %v3567_v14 }
 0x170   :  { %2678 = vmatpush1.bf16.msra.mxu0 %v2677_v5  ;;  %2686 = vmatpush1.bf16.msra.mxu1 %v2685_v6  ;;  %v44_v5 = vunpack.c.l.bf16 %v2899_v4 }
 0x171   :  { %2267 = vst.msk [vmem:[#allocation4 + $0x8] sm:$0xff] %vm1544_vm0, %v1469_v19  ;;  %1621 = vmatprep.mubr.f32.mxu0 %v3000_v46  ;;  %1698 = vmatprep.mubr.f32.mxu1 %v3000_v46  ;;  %v2199_v23 = vmul.f32 %v2197_v20, %v1468_v8  ;;  %v2217_v24 = vmul.f32 %v2831_v22, %v2209_v21  ;;  %v2198_v25 = vmul.f32 -0.5, %v1469_v19 }
 0x172   :  { %v2210_v26 = vsub.f32 %v1469_v19, %v3571_v17  ;;  %2680 = vmatprep.subr.bf16.mxu0 %v2679_v16  ;;  %2688 = vmatprep.subr.bf16.mxu1 %v2687_v18  ;;  %v45_v16 = vunpack.c.h.bf16 %v2899_v4 }
 0x173   :  { %2472 = vmatmul.mubr.msk.f32.gmra.mrb[18].mxu0 %vm1544_vm0, %v1469_v19  ;;  %2474 = vmatmul.mubr.msk.f32.gmra.mrb[18].mxu1 %vm1544_vm0, %v1469_v19  ;;  %v2479_v14 = vadd.f32 -0.9189385, %v2199_v23  ;;  %v2221_v28 = vmul.f32 0.5, %v2217_v24  ;;  %v2200_v29 = vmul.f32 %v2198_v25, %v1469_v19 }
 0x174   :  { %v2218_v30 = vmul.f32 %v2833_v27, %v2210_v26  ;;  %2682 = vmatpush1.bf16.msra.mxu0 %v2681_v13  ;;  %2690 = vmatpush1.bf16.msra.mxu1 %v2689_v15 }
 0x175   :  { %v2203_v32 = vsel %vm1544_vm0, %v2479_v14, 0.0  ;;  %1769 = vmatprep.mubr.f32.mxu0 %v3000_v46  ;;  %1846 = vmatprep.mubr.f32.mxu1 %v3000_v46  ;;  %v2223_v17 = vmul.f32 %v2221_v28, %v2217_v24  ;;  %v2480_v33 = vadd.f32 -0.9189385, %v2200_v29  ;;  %v2900_v24 = vld [vmem:[%s4264_s0 + $0x20] sm:$0xff] }
 0x176   :  { %v2222_v34 = vmul.f32 0.5, %v2218_v30  ;;  %2204 = vadd.xlane.f32.xlu0 %v2203_v32  ;;  %v50_v25 = vunpack.c.l.bf16 %v2900_v24  ;;  %v51_v29 = vunpack.c.h.bf16 %v2900_v24 }
 0x177   :  { %2475 = vmatmul.mubr.msk.f32.vlgmr.msra.gmra.mrb[20].mxu0 %vm1544_vm0, %v1468_v8  ;;  %2477 = vmatmul.mubr.msk.f32.vlgmr.msra.gmra.mrb[20].mxu1 %vm1544_vm0, %v1468_v8  ;;  %v2225_v35 = vsub.f32 %v2481_v31, %v2223_v17  ;;  %v2206_v41 = vsel %vm1544_vm0, %v2480_v33, 0.0  ;;  %v43_v8 = vunpack.c.h.bf16 %v2898_v2  ;;  %v2901_v17 = vld [vmem:[%s4264_s0 + $0x28] sm:$0xff]  ;;  %v1526_v2 = vsub.s32 5, %v3660_v48 }
 0x178   :  { %v2224_v37 = vmul.f32 %v2222_v34, %v2218_v30  ;;  %1775 = vmatprep.mubr.f32.mxu0 %v3000_v46  ;;  %1852 = vmatprep.mubr.f32.mxu1 %v3000_v46  ;;  %v2243_v46 = vadd.s32 4294967288, %v2238_v45  ;;  %v52_v33 = vunpack.c.l.bf16 %v2901_v17 }
 0x179   :  { %v2227_v38 = vsel %vm1544_vm0, %v2225_v35, 0.0 }
 0x17a   :  { %v2226_v42 = vsub.f32 %v2482_v36, %v2224_v37  ;;  %2228 = vadd.xlane.f32.xlu1 %v2227_v38  ;;  %2207 = vadd.xlane.f32.xlu0 %v2206_v41  ;;  %v3666_v52 = vsub.s32 %v2243_v46, %v3660_v48  ;;  %v1522_v46 = vsub.s32 4, %v3660_v48 }
 0x17b   :  { %2476 = vmatmul.mubr.msk.f32.gmra.mrb[22].mxu0 %vm1544_vm0, %v1469_v19  ;;  %2478 = vmatmul.mubr.msk.f32.gmra.mrb[22].mxu1 %vm1544_vm0, %v1469_v19 }
 0x17c   :  { %v2230_v43 = vsel %vm1544_vm0, %v2226_v42, 0.0  ;;  %4278 = vst [vmem:[#allocation13_spill] sm:$0xff] %v3666_v52 }
 0x17e   :  { %2231 = vadd.xlane.f32.xlu1 %v2230_v43 }
 0x203   :  { %v2205_v47 = vpop.xlane.xlu0 %2204 }
 0x207   :  { %v2229_v49 = vpop.xlane.xlu1 %2228  ;;  %v2208_v53 = vpop.xlane.xlu0 %2207 }
 0x208   :  { %v2233_v51 = vsub.f32 %v2229_v49, %v2205_v47 }
 0x20a   :  { %v2258_v39 = vrot.slane %v2233_v51, %v3663_v50 }
 0x20b   :  { %v2232_v54 = vpop.xlane.xlu1 %2231 }
 0x20c   :  { %v2234_v55 = vsub.f32 %v2232_v54, %v2208_v53 }
 0x20e   :  { %v2262_v40 = vrot.slane %v2234_v55, %v3666_v52  ;;  %v53_v55 = vunpack.c.h.bf16 %v2901_v17 }
 0x210   :  { %v2263_v56 = vsel %vm2248_vm1, %v2262_v40, %v2258_v39 }
 0x211   :  { %2265 = vst.msk [vmem:[#allocation2 + $0x1] sm:$0x1] %vm2251_vm2, %v2263_v56  ;;  %v1530_v56 = vsub.s32 6, %v3660_v48 }
 0x242   :  { %v1617_v6 = vpop.f32.mrb[16].mxu0  ;;  %v1694_v7 = vpop.f32.mrb[16].mxu1 }
 0x243   :  { %v3693_v9 = vadd.f32 %v1617_v6, %v1507_v62  ;;  %v3695_v10 = vadd.f32 %v1694_v7, %v1515_v63  ;;  %v1619_v11 = vpop.f32.mrb[17].mxu0  ;;  %v1696_v12 = vpop.f32.mrb[17].mxu1 }
 0x244   :  { %v3697_v18 = vadd.f32 %v1619_v11, %v1511_v0  ;;  %v3700_v19 = vadd.f32 %v1696_v12, %v3685_v1  ;;  %v3763_v11 = vld [vmem:[%s4264_s0 + $0x10] sm:$0xff] }
 0x245   :  { %v3703_v20 = vmul.f32 %v3693_v9, %v42_v3  ;;  %v1923_v21 = vand.u32 2147483647, %v3693_v9  ;;  %v3707_v22 = vmul.f32 %v3695_v10, %v44_v5  ;;  %v1925_v13 = vand.u32 2147483647, %v3695_v10 }
 0x246   :  { %v1623_v15 = vpop.f32.mrb[18].mxu0  ;;  %v1700_v23 = vpop.f32.mrb[18].mxu1  ;;  %v3714_v27 = vmul.f32 %v3697_v18, %v43_v8  ;;  %v1924_v31 = vand.u32 2147483647, %v3697_v18  ;;  %v3718_v32 = vmul.f32 %v3700_v19, %v45_v16  ;;  %v1926_v35 = vand.u32 2147483647, %v3700_v19 }
 0x247   :  { %v1939_v26 = vsub.f32 0.0, %v1923_v21  ;;  %v1625_v14 = vpop.f32.mrb[19].mxu0  ;;  %v1702_v28 = vpop.f32.mrb[19].mxu1  ;;  %v1941_v30 = vsub.f32 0.0, %v1925_v13  ;;  %v3724_v36 = vadd.f32 %v1623_v15, %v1507_v62  ;;  %v3726_v41 = vadd.f32 %v1700_v23, %v1515_v63  ;;  %v3769_v21 = vld [vmem:[%s4264_s0 + $0x30] sm:$0xff] }
 0x248   :  { %v1940_v38 = vsub.f32 0.0, %v1924_v31  ;;  %v3728_v42 = vadd.f32 %v1625_v14, %v1511_v0  ;;  %v1942_v45 = vsub.f32 0.0, %v1926_v35  ;;  %v3749_v0 = vrot.slane %v3677_v59, %v1522_v46 }
 0x249   :  { %v1955_v34 = vmul.f32 1.442695, %v1939_v26  ;;  %v1959_v37 = vmul.f32 1.442695, %v1941_v30  ;;  %v3731_v47 = vmul.f32 %v3724_v36, %v50_v25  ;;  %v1931_v54 = vand.u32 2147483647, %v3724_v36 }
 0x24a   :  { %v1771_v43 = vpop.f32.mrb[20].mxu0  ;;  %v1848_v44 = vpop.f32.mrb[20].mxu1  ;;  %v1957_v53 = vmul.f32 1.442695, %v1940_v38  ;;  %v1961_v39 = vmul.f32 1.442695, %v1942_v45  ;;  %v3736_v40 = vmul.f32 %v3726_v41, %v52_v33  ;;  %v3741_v60 = vmul.f32 %v3728_v42, %v51_v29 }
 0x24b   :  { %2834 = vpow2.f32 %v1955_v34  ;;  %v1773_v49 = vpop.f32.mrb[21].mxu0  ;;  %v1850_v51 = vpop.f32.mrb[21].mxu1  ;;  %v1947_v57 = vsub.f32 0.0, %v1931_v54  ;;  %v1933_v58 = vand.u32 2147483647, %v3726_v41  ;;  %v3757_v7 = vadd.f32 %v1702_v28, %v3685_v1  ;;  %v3791_v28 = vld [vmem:[%s4264_s0 + $0x18] sm:$0xff] }
 0x24c   :  { %2836 = vpow2.f32 %v1959_v37  ;;  %v1932_v63 = vand.u32 2147483647, %v3728_v42  ;;  %v1534_v8 = vsub.s32 7, %v3660_v48  ;;  %v3777_v24 = vadd.f32 %v1771_v43, %v3749_v0  ;;  %v3799_v33 = vld [vmem:[%s4264_s0 + $0x38] sm:$0xff]  ;;  %s3001_s0 = smov [#allocation4]  }
 0x24d   :  { %2838 = vpow2.f32 %v1957_v53  ;;  %v1971_v5 = vmul.f32 1.442695, %v1947_v57  ;;  %v1949_v6 = vsub.f32 0.0, %v1933_v58  ;;  %v3773_v15 = vmul.f32 %v3757_v7, %v53_v55  ;;  %s2287_s1 = sshll.u32 %s3001_s0, 4  ;;  %s2288_s1 = int_to_ptr.vmem [resolvable:$true] %s2287_s1 }
 0x24e   :  { %v3743_v61 = vpop.f32.mrb[22].mxu0  ;;  %v3745_v62 = vpop.f32.mrb[22].mxu1  ;;  %2840 = vpow2.f32 %v1961_v39  ;;  %v1948_v16 = vsub.f32 0.0, %v1932_v63  ;;  %v1934_v23 = vand.u32 2147483647, %v3757_v7  ;;  %v3780_v25 = vrot.slane %v3677_v59, %v1530_v56  ;;  %s2906_s16 = scalar_lea.vmem %s2288_s1, 256  ;;  %p2911_p1 = scmp.lt.s32.totalorder %s2288_s1, %s2288_s1 }
 0x24f   :  { %v3752_v3 = vpop.f32.mrb[23].mxu0  ;;  %v3754_v4 = vpop.f32.mrb[23].mxu1  ;;  %2842 = vpow2.f32 %v1971_v5  ;;  %v1975_v1 = vmul.f32 1.442695, %v1949_v6  ;;  %v3783_v26 = vrot.slane %v3677_v59, %v1526_v2  ;;  %v3786_v14 = vrot.slane %v3677_v59, %v1534_v8  ;;  %p2907_p0 = scmp.ne.s32.totalorder %s2288_s1, %s2906_s16  ;;  %p2912_p2 = scmp.lt.s32.totalorder %s2906_s16, %s2906_s16 }
 0x250   :  { %v1973_v48 = vmul.f32 1.442695, %v1948_v16  ;;  %v1950_v38 = vsub.f32 0.0, %v1934_v23  ;;  %v1927_v53 = vand.u32 2147483647, %v3777_v24  ;;  %v3809_v54 = vadd.f32 %v1848_v44, %v3780_v25 }
 0x251   :  { %2844 = vpow2.f32 %v1975_v1  ;;  %v3815_v56 = vadd.f32 %v1773_v49, %v3783_v26  ;;  %v3818_v57 = vadd.f32 %v1850_v51, %v3786_v14  ;;  %vm1891_vm4 = vcmp.ne.f32.partialorder %v3693_v9, %v3693_v9  ;;  %p2913_p3 = por %p2912_p2, %p2911_p1 }
 0x252   :  { %2846 = vpow2.f32 %v1973_v48  ;;  %v1977_v49 = vmul.f32 1.442695, %v1950_v38  ;;  %v1943_v51 = vsub.f32 0.0, %v1927_v53  ;;  %v1929_v48 = vand.u32 2147483647, %v3809_v54 }
 0x253   :  { %v1928_v43 = vand.u32 2147483647, %v3815_v56  ;;  %v1930_v13 = vand.u32 2147483647, %v3818_v57  ;;  %vm1892_vm5 = vcmp.ne.f32.partialorder %v3697_v18, %v3697_v18  ;;  %vm1899_vm8 = vcmp.ne.f32.partialorder %v3724_v36, %v3724_v36  ;;  %p2914_p4 = pnand %p2913_p3, %p2907_p0 }
 0x254   :  { %v1963_v5 = vmul.f32 1.442695, %v1943_v51  ;;  %v1945_v8 = vsub.f32 0.0, %v1929_v48  ;;  %vm1900_vm12 = vcmp.ne.f32.partialorder %v3728_v42, %v3728_v42  ;;  %vm1893_vm13 = vcmp.ne.f32.partialorder %v3695_v10, %v3695_v10 }
 0x255   :  { %v2835_v30 = vpop.eup %2834  ;;  %v1944_v52 = vsub.f32 0.0, %v1928_v43  ;;  %vm1901_vm14 = vcmp.ne.f32.partialorder %v3726_v41, %v3726_v41  ;;  %vm1894_vm0 = vcmp.ne.f32.partialorder %v3700_v19, %v3700_v19 }
 0x256   :  { %v3802_v34 = vpop.eup %2836  ;;  %v1987_v37 = vadd.f32 1.0, %v2835_v30  ;;  %v1990_v45 = vmul.f32 -0.5, %v2835_v30  ;;  %v1993_v6 = vand.u32 2147483647, %v2835_v30 }
 0x257   :  { %v3811_v55 = vpop.eup %2838  ;;  %v2005_v63 = vadd.f32 1.0, %v3802_v34  ;;  %v2008_v2 = vmul.f32 -0.5, %v3802_v34  ;;  %v2011_v53 = vand.u32 2147483647, %v3802_v34 }
 0x258   :  { %2848 = vlog2.f32 %v1987_v37  ;;  %v3820_v58 = vpop.eup %2840  ;;  %v1996_v44 = vadd.f32 1.0, %v3811_v55  ;;  %v1991_v1 = vadd.f32 1.0, %v1990_v45  ;;  %v1999_v29 = vmul.f32 -0.5, %v3811_v55 }
 0x259   :  { %v2843_v23 = vpop.eup %2842  ;;  %v2014_v37 = vadd.f32 1.0, %v3820_v58  ;;  %v2009_v17 = vadd.f32 1.0, %v2008_v2  ;;  %vm3836_vm3 = vcmp.lt.f32.partialorder %v1993_v6, 0.0004427343  ;;  %v2002_v16 = vand.u32 2147483647, %v3811_v55 }
 0x25a   :  { %2850 = vlog2.f32 %v1996_v44  ;;  %v2059_v31 = vadd.f32 1.0, %v2843_v23  ;;  %v2062_v44 = vmul.f32 -0.5, %v2843_v23  ;;  %v2017_v6 = vmul.f32 -0.5, %v3820_v58 }
 0x25b   :  { %2852 = vlog2.f32 %v2005_v63  ;;  %v3834_v38 = vpop.eup %2844  ;;  %v1992_v63 = vmul.f32 %v2835_v30, %v1991_v1  ;;  %v3850_v59 = vmul.f32 %v3802_v34, %v2009_v17  ;;  %v2065_v1 = vand.u32 2147483647, %v2843_v23 }
 0x25c   :  { %2854 = vpow2.f32 %v1977_v49  ;;  %v3841_v12 = vpop.eup %2846  ;;  %v2077_v2 = vadd.f32 1.0, %v3834_v38  ;;  %v2000_v49 = vadd.f32 1.0, %v1999_v29  ;;  %v2083_v35 = vand.u32 2147483647, %v3834_v38 }
 0x25d   :  { %2856 = vlog2.f32 %v2059_v31  ;;  %v2068_v46 = vadd.f32 1.0, %v3841_v12  ;;  %v2063_v31 = vadd.f32 1.0, %v2062_v44  ;;  %vm3857_vm6 = vcmp.lt.f32.partialorder %v2002_v16, 0.0004427343 }
 0x25e   :  { %2858 = vlog2.f32 %v2014_v37  ;;  %v2080_v37 = vmul.f32 -0.5, %v3834_v38  ;;  %v3861_v29 = vadd.f32 1.0, %v2017_v6  ;;  %v2071_v34 = vmul.f32 -0.5, %v3841_v12 }
 0x25f   :  { %2860 = vlog2.f32 %v2077_v2  ;;  %v2074_v48 = vand.u32 2147483647, %v3841_v12  ;;  %vm3867_vm7 = vcmp.lt.f32.partialorder %v2011_v53, 0.0004427343  ;;  %v2001_v43 = vmul.f32 %v3811_v55, %v2000_v49 }
 0x260   :  { %2862 = vlog2.f32 %v2068_v46  ;;  %v1967_v16 = vmul.f32 1.442695, %v1945_v8  ;;  %v3874_v44 = vadd.f32 %v3743_v61, %v3749_v0  ;;  %v4285_v6 = vmax.f32 %v3693_v9, 0.0 }
 0x261   :  { %v2064_v45 = vmul.f32 %v2843_v23, %v2063_v31  ;;  %vm3880_vm9 = vcmp.lt.f32.partialorder %v2065_v1, 0.0004427343  ;;  %vm3884_vm10 = vcmp.lt.f32.partialorder %v2083_v35, 0.0004427343  ;;  %v1965_v61 = vmul.f32 1.442695, %v1944_v52 }
 0x262   :  { %v2849_v39 = vpop.eup %2848  ;;  %v1946_v0 = vsub.f32 0.0, %v1930_v13  ;;  %v2072_v31 = vadd.f32 1.0, %v2071_v34  ;;  %vm3898_vm11 = vcmp.lt.f32.partialorder %v2074_v48, 0.0004427343  ;;  %v4292_v13 = vmax.f32 %v3697_v18, 0.0 }
 0x263   :  { %v1989_v51 = vmul.f32 0.6931472, %v2849_v39  ;;  %2864 = vpow2.f32 %v1963_v5  ;;  %v3912_v48 = vadd.f32 %v3745_v62, %v3780_v25  ;;  %v3958_v1 = vadd.f32 %v3754_v4, %v3786_v14 }
 0x264   :  { %v2851_v2 = vpop.eup %2850  ;;  %2866 = vpow2.f32 %v1965_v61  ;;  %v2073_v25 = vmul.f32 %v3841_v12, %v2072_v31  ;;  %v2019_v55 = vmul.f32 %v3820_v58, %v3861_v29 }
 0x265   :  { %v1995_v46 = vsel %vm3836_vm3, %v1992_v63, %v1989_v51  ;;  %v1998_v50 = vmul.f32 0.6931472, %v2851_v2  ;;  %v2853_v63 = vpop.eup %2852  ;;  %v2081_v51 = vadd.f32 1.0, %v2080_v37  ;;  %v1937_v53 = vand.u32 2147483647, %v3912_v48 }
 0x266   :  { %v2131_v30 = vadd.f32 %v1995_v46, %v4285_v6  ;;  %v3888_v8 = vpop.eup %2854 }
 0x267   :  { %v2004_v23 = vsel %vm3857_vm6, %v2001_v43, %v1998_v50  ;;  %v2857_v35 = vpop.eup %2856  ;;  %v2007_v50 = vmul.f32 0.6931472, %v2853_v63  ;;  %v2086_v34 = vadd.f32 1.0, %v3888_v8  ;;  %v2082_v5 = vmul.f32 %v3834_v38, %v2081_v51 }
 0x268   :  { %v3894_v49 = vsel %vm1891_vm4, %v3693_v9, %v2131_v30  ;;  %v2132_v37 = vadd.f32 %v2004_v23, %v4292_v13  ;;  %v1935_v9 = vand.u32 2147483647, %v3874_v44  ;;  %v2859_v30 = vpop.eup %2858  ;;  %v2061_v17 = vmul.f32 0.6931472, %v2857_v35 }
 0x269   :  { %v2861_v2 = vpop.eup %2860  ;;  %v1969_v43 = vmul.f32 1.442695, %v1946_v0  ;;  %v4293_v35 = vmax.f32 %v3724_v36, 0.0  ;;  %2868 = vlog2.f32 %v2086_v34  ;;  %v2013_v38 = vsel %vm3867_vm7, %v3850_v59, %v2007_v50 }
 0x26a   :  { %v3918_v46 = vsel %vm1892_vm5, %v3697_v18, %v2132_v37  ;;  %v2863_v6 = vpop.eup %2862  ;;  %v2067_v23 = vsel %vm3880_vm9, %v2064_v45, %v2061_v17  ;;  %v2079_v62 = vmul.f32 0.6931472, %v2861_v2  ;;  %v1951_v18 = vsub.f32 0.0, %v1935_v9 }
 0x26b   :  { %v2164_v63 = vsub.f32 %v3714_v27, %v3918_v46  ;;  %v2139_v13 = vadd.f32 %v2067_v23, %v4293_v35  ;;  %v2070_v52 = vmul.f32 0.6931472, %v2863_v6  ;;  %2870 = vpow2.f32 %v1967_v16 }
 0x26c   :  { %v3936_v45 = vadd.f32 %v3752_v3, %v3783_v26  ;;  %v2016_v12 = vmul.f32 0.6931472, %v2859_v30  ;;  %2872 = vpow2.f32 %v1969_v43  ;;  %v2085_v3 = vsel %vm3884_vm10, %v2082_v5, %v2079_v62 }
 0x26d   :  { %v3942_v51 = vsel %vm1899_vm8, %v3724_v36, %v2139_v13  ;;  %v2076_v61 = vsel %vm3898_vm11, %v2073_v25, %v2070_v52  ;;  %v4294_v26 = vmax.f32 %v3728_v42, 0.0  ;;  %v2089_v16 = vmul.f32 -0.5, %v3888_v8  ;;  %v3976_v4 = vpop.eup %2864 }
 0x26e   :  { %v2171_v59 = vsub.f32 %v3731_v47, %v3942_v51  ;;  %v1979_v36 = vmul.f32 1.442695, %v1951_v18  ;;  %v1953_v0 = vsub.f32 0.0, %v1937_v53  ;;  %v1936_v31 = vand.u32 2147483647, %v3936_v45  ;;  %v3989_v6 = vpop.eup %2866 }
 0x26f   :  { %v2140_v39 = vadd.f32 %v2076_v61, %v4294_v26  ;;  %v4295_v52 = vmax.f32 %v3695_v10, 0.0  ;;  %v4296_v9 = vand.u32 2147483647, %v3820_v58  ;;  %v2092_v17 = vand.u32 2147483647, %v3888_v8 }
 0x270   :  { %v1952_v29 = vsub.f32 0.0, %v1936_v31  ;;  %v1938_v58 = vand.u32 2147483647, %v3958_v1  ;;  %v4299_v2 = vmax.f32 %v3726_v41, 0.0  ;;  %v1886_v5 = vmax.f32 %v3757_v7, 0.0 }
 0x271   :  { %v2133_v37 = vadd.f32 %v2013_v38, %v4295_v52  ;;  %vm3966_vm15 = vcmp.lt.f32.partialorder %v4296_v9, 0.0004427343  ;;  %v3974_v50 = vsel %vm1900_vm12, %v3728_v42, %v2140_v39  ;;  %v2090_v43 = vadd.f32 1.0, %v2089_v16 }
 0x272   :  { %v2172_v14 = vsub.f32 %v3741_v60, %v3974_v50  ;;  %v2022_v34 = vsel %vm3966_vm15, %v2019_v55, %v2016_v12  ;;  %v2141_v42 = vadd.f32 %v2085_v3, %v4299_v2  ;;  %2874 = vpow2.f32 %v1979_v36 }
 0x273   :  { %v1983_v23 = vmul.f32 1.442695, %v1953_v0  ;;  %v1981_v62 = vmul.f32 1.442695, %v1952_v29  ;;  %v1954_v25 = vsub.f32 0.0, %v1938_v58  ;;  %v1879_v35 = vmax.f32 %v3777_v24, 0.0  ;;  %v2869_v53 = vpop.eup %2868 }
 0x274   :  { %v1880_v13 = vmax.f32 %v3815_v56, 0.0  ;;  %v1887_v18 = vmax.f32 %v3874_v44, 0.0  ;;  %v2023_v38 = vadd.f32 1.0, %v3976_v4  ;;  %v2149_v12 = vsel %vm1893_vm13, %v3695_v10, %v2133_v37 }
 0x275   :  { %v4300_v61 = vmax.f32 %v3700_v19, 0.0  ;;  %vm4001_vm3 = vcmp.lt.f32.partialorder %v2092_v17, 0.0004427343  ;;  %2876 = vpow2.f32 %v1981_v62  ;;  %v4005_v39 = vpop.eup %2870  ;;  %v2091_v16 = vmul.f32 %v3888_v8, %v2090_v43 }
 0x276   :  { %v1985_v36 = vmul.f32 1.442695, %v1954_v25  ;;  %2878 = vlog2.f32 %v2023_v38  ;;  %v2032_v0 = vadd.f32 1.0, %v3989_v6  ;;  %v2873_v31 = vpop.eup %2872  ;;  %v4013_v10 = vsel %vm1901_vm14, %v3726_v41, %v2141_v42 }
 0x277   :  { %v2134_v3 = vadd.f32 %v2022_v34, %v4300_v61  ;;  %2880 = vpow2.f32 %v1983_v23  ;;  %v1888_v52 = vmax.f32 %v3936_v45, 0.0  ;;  %v2026_v37 = vmul.f32 -0.5, %v3976_v4 }
 0x278   :  { %v2088_v55 = vmul.f32 0.6931472, %v2869_v53  ;;  %v4303_v9 = vunpack.c.l.bf16 %v3763_v11  ;;  %v4304_v30 = vunpack.c.h.bf16 %v3763_v11  ;;  %2882 = vlog2.f32 %v2032_v0 }
 0x279   :  { %v4305_v41 = vunpack.c.l.bf16 %v3791_v28  ;;  %v4306_v58 = vunpack.c.h.bf16 %v3791_v28  ;;  %v2035_v2 = vmul.f32 -0.5, %v3989_v6  ;;  %v2041_v42 = vadd.f32 1.0, %v4005_v39 }
 0x27a   :  { %v4020_v8 = vmul.f32 %v3777_v24, %v4303_v9  ;;  %v4025_v17 = vmul.f32 %v3815_v56, %v4304_v30  ;;  %2884 = vpow2.f32 %v1985_v36  ;;  %v1881_v11 = vmax.f32 %v3809_v54, 0.0 }
 0x27b   :  { %v4030_v29 = vmul.f32 %v3809_v54, %v4305_v41  ;;  %v4035_v34 = vmul.f32 %v3818_v57, %v4306_v58  ;;  %v2029_v43 = vand.u32 2147483647, %v3976_v4  ;;  %v2050_v23 = vadd.f32 1.0, %v2873_v31 }
 0x27c   :  { %v2027_v62 = vadd.f32 1.0, %v2026_v37  ;;  %2886 = vlog2.f32 %v2041_v42  ;;  %v2044_v25 = vmul.f32 -0.5, %v4005_v39  ;;  %v2150_v28 = vsel %vm1894_vm0, %v3700_v19, %v2134_v3  ;;  %v4049_v36 = vpop.eup %2874 }
 0x27d   :  { %v2094_v38 = vsel %vm4001_vm3, %v2091_v16, %v2088_v55  ;;  %2888 = vlog2.f32 %v2050_v23  ;;  %v2053_v53 = vmul.f32 -0.5, %v2873_v31  ;;  %v2165_v61 = vsub.f32 %v3707_v22, %v2149_v12 }
 0x27e   :  { %v2036_v0 = vadd.f32 1.0, %v2035_v2  ;;  %v2038_v37 = vand.u32 2147483647, %v3989_v6  ;;  %v2166_v9 = vsub.f32 %v3718_v32, %v2150_v28  ;;  %v4307_v30 = vsub.f32 %v3703_v20, %v3894_v49 }
 0x27f   :  { %v1882_v3 = vmax.f32 %v3818_v57, 0.0  ;;  %vm1895_vm4 = vcmp.ne.f32.partialorder %v3777_v24, %v3777_v24  ;;  %v2047_v22 = vand.u32 2147483647, %v4005_v39  ;;  %v2056_v12 = vand.u32 2147483647, %v2873_v31  ;;  %v4063_v26 = vpop.eup %2876 }
 0x280   :  { %v2179_v19 = vadd.f32 %v2164_v63, %v4307_v30  ;;  %vm1896_vm5 = vcmp.ne.f32.partialorder %v3815_v56, %v3815_v56  ;;  %vm4067_vm6 = vcmp.lt.f32.partialorder %v2029_v43, 0.0004427343  ;;  %v2045_v20 = vadd.f32 1.0, %v2044_v25  ;;  %v2879_v49 = vpop.eup %2878 }
 0x281   :  { %v2142_v46 = vadd.f32 %v2094_v38, %v1886_v5  ;;  %v2028_v63 = vmul.f32 %v3976_v4, %v2027_v62  ;;  %v2054_v16 = vadd.f32 1.0, %v2053_v53  ;;  %v2095_v55 = vadd.f32 1.0, %v4049_v36  ;;  %v4073_v41 = vpop.eup %2880 }
 0x282   :  { %v2180_v27 = vadd.f32 %v2179_v19, %v2165_v61  ;;  %v2025_v58 = vmul.f32 0.6931472, %v2879_v49  ;;  %v2037_v2 = vmul.f32 %v3989_v6, %v2036_v0  ;;  %vm4076_vm7 = vcmp.lt.f32.partialorder %v2038_v37, 0.0004427343  ;;  %v2883_v23 = vpop.eup %2882 }
 0x283   :  { %vm1897_vm8 = vcmp.ne.f32.partialorder %v3809_v54, %v3809_v54  ;;  %vm4082_vm9 = vcmp.lt.f32.partialorder %v2047_v22, 0.0004427343  ;;  %vm4086_vm10 = vcmp.lt.f32.partialorder %v2056_v12, 0.0004427343  ;;  %2890 = vlog2.f32 %v2095_v55 }
 0x284   :  { %v2181_v43 = vadd.f32 %v2180_v27, %v2166_v9  ;;  %v2104_v6 = vadd.f32 1.0, %v4063_v26  ;;  %vm1902_vm11 = vcmp.ne.f32.partialorder %v3757_v7, %v3757_v7  ;;  %vm1898_vm12 = vcmp.ne.f32.partialorder %v3818_v57, %v3818_v57  ;;  %v4099_v53 = vpop.eup %2884 }
 0x285   :  { %v2031_v62 = vsel %vm4067_vm6, %v2028_v63, %v2025_v58  ;;  %v2034_v25 = vmul.f32 0.6931472, %v2883_v23  ;;  %v2046_v28 = vmul.f32 %v4005_v39, %v2045_v20  ;;  %v2098_v38 = vmul.f32 -0.5, %v4049_v36 }
 0x286   :  { %v2055_v61 = vmul.f32 %v2873_v31, %v2054_v16  ;;  %v2135_v0 = vadd.f32 %v2031_v62, %v1879_v35  ;;  %v4316_v37 = vunpack.c.l.bf16 %v3769_v21  ;;  %2892 = vlog2.f32 %v2104_v6  ;;  %v2887_v30 = vpop.eup %2886 }
 0x287   :  { %v2040_v19 = vsel %vm4076_vm7, %v2037_v2, %v2034_v25  ;;  %v2101_v39 = vand.u32 2147483647, %v4049_v36  ;;  %v2107_v22 = vmul.f32 -0.5, %v4063_v26  ;;  %v2113_v12 = vadd.f32 1.0, %v4073_v41  ;;  %v2889_v31 = vpop.eup %2888 }
 0x288   :  { %v4106_v9 = vmul.f32 %v3874_v44, %v4316_v37  ;;  %v2043_v32 = vmul.f32 0.6931472, %v2887_v30  ;;  %v2136_v35 = vadd.f32 %v2040_v19, %v1880_v13  ;;  %v2151_v20 = vsel %vm1895_vm4, %v3777_v24, %v2135_v0 }
 0x289   :  { %v2110_v27 = vand.u32 2147483647, %v4063_v26  ;;  %v2052_v49 = vmul.f32 0.6931472, %v2889_v31  ;;  %v2167_v63 = vsub.f32 %v4020_v8, %v2151_v20  ;;  %v2099_v16 = vadd.f32 1.0, %v2098_v38 }
 0x28a   :  { %2894 = vlog2.f32 %v2113_v12  ;;  %v2049_v55 = vsel %vm4082_vm9, %v2046_v28, %v2043_v32  ;;  %v2152_v13 = vsel %vm1896_vm5, %v3815_v56, %v2136_v35  ;;  %v2116_v58 = vmul.f32 -0.5, %v4073_v41 }
 0x28b   :  { %v2122_v2 = vadd.f32 1.0, %v4099_v53  ;;  %v2058_v24 = vsel %vm4086_vm10, %v2055_v61, %v2052_v49  ;;  %v2137_v8 = vadd.f32 %v2049_v55, %v1881_v11  ;;  %v2168_v42 = vsub.f32 %v4025_v17, %v2152_v13 }
 0x28c   :  { %v2182_v23 = vadd.f32 %v2181_v43, %v2167_v63  ;;  %v2138_v5 = vadd.f32 %v2058_v24, %v1882_v3  ;;  %v4317_v6 = vunpack.c.h.bf16 %v3769_v21  ;;  %vm4137_vm13 = vcmp.lt.f32.partialorder %v2101_v39, 0.0004427343 }
 0x28d   :  { %2896 = vlog2.f32 %v2122_v2  ;;  %v2153_v4 = vsel %vm1897_vm8, %v3809_v54, %v2137_v8  ;;  %v2108_v11 = vadd.f32 1.0, %v2107_v22  ;;  %v2125_v17 = vmul.f32 -0.5, %v4099_v53  ;;  %v2891_v43 = vpop.eup %2890 }
 0x28e   :  { %v1872_v62 = vmul.f32 %v3936_v45, %v4317_v6  ;;  %v2183_v25 = vadd.f32 %v2182_v23, %v2168_v42  ;;  %v2154_v21 = vsel %vm1898_vm12, %v3818_v57, %v2138_v5  ;;  %v2169_v3 = vsub.f32 %v4030_v29, %v2153_v4 }
 0x28f   :  { %v2158_v28 = vsel %vm1902_vm11, %v3757_v7, %v2142_v46  ;;  %v2173_v54 = vsub.f32 %v3736_v40, %v4013_v10  ;;  %v2097_v38 = vmul.f32 0.6931472, %v2891_v43  ;;  %v2100_v61 = vmul.f32 %v4049_v36, %v2099_v16 }
 0x290   :  { %vm4158_vm14 = vcmp.lt.f32.partialorder %v2110_v27, 0.0004427343  ;;  %v2117_v37 = vadd.f32 1.0, %v2116_v58  ;;  %v2893_v30 = vpop.eup %2892  ;;  %v2170_v57 = vsub.f32 %v4035_v34, %v2154_v21  ;;  %v2184_v29 = vadd.f32 %v2183_v25, %v2169_v3 }
 0x291   :  { %v2174_v19 = vsub.f32 %v3773_v15, %v2158_v28  ;;  %v2188_v40 = vadd.f32 %v2172_v14, %v2171_v59  ;;  %v2103_v7 = vsel %vm4137_vm13, %v2100_v61, %v2097_v38  ;;  %v2106_v10 = vmul.f32 0.6931472, %v2893_v30 }
 0x292   :  { %v2109_v36 = vmul.f32 %v4063_v26, %v2108_v11  ;;  %v2119_v46 = vand.u32 2147483647, %v4073_v41  ;;  %v2185_v39 = vadd.f32 %v2184_v29, %v2170_v57  ;;  %v2126_v34 = vadd.f32 1.0, %v2125_v17 }
 0x293   :  { %v2143_v15 = vadd.f32 %v2103_v7, %v1887_v18  ;;  %v2189_v22 = vadd.f32 %v2188_v40, %v2173_v54  ;;  %vm1903_vm15 = vcmp.ne.f32.partialorder %v3874_v44, %v3874_v44  ;;  %v2118_v60 = vmul.f32 %v4073_v41, %v2117_v37 }
 0x294   :  { %v2895_v12 = vpop.eup %2894  ;;  %v2112_v47 = vsel %vm4158_vm14, %v2109_v36, %v2106_v10  ;;  %v2128_v51 = vand.u32 2147483647, %v4099_v53  ;;  %2186 = vadd.xlane.f32.xlu0 %v2185_v39  ;;  %v1889_v26 = vmax.f32 %v3912_v48, 0.0  ;;  %vm1904_vm0 = vcmp.ne.f32.partialorder %v3936_v45, %v3936_v45 }
 0x295   :  { %v2115_v59 = vmul.f32 0.6931472, %v2895_v12  ;;  %v2144_v50 = vadd.f32 %v2112_v47, %v1888_v52  ;;  %v2159_v14 = vsel %vm1903_vm15, %v3874_v44, %v2143_v15  ;;  %v2190_v18 = vadd.f32 %v2189_v22, %v2174_v19 }
 0x296   :  { %vm2120_vm3 = vcmp.lt.f32.partialorder %v2119_v46, 0.0004427343  ;;  %v2175_v31 = vsub.f32 %v4106_v9, %v2159_v14  ;;  %v57_v41 = vunpack.c.h.bf16 %v3799_v33  ;;  %v2127_v20 = vmul.f32 %v4099_v53, %v2126_v34 }
 0x297   :  { %v2897_v32 = vpop.eup %2896  ;;  %v2121_v35 = vsel %vm2120_vm3, %v2118_v60, %v2115_v59  ;;  %v2160_v27 = vsel %vm1904_vm0, %v3936_v45, %v2144_v50  ;;  %v4322_v16 = vunpack.c.l.bf16 %v3799_v33  ;;  %v1890_v13 = vmax.f32 %v3958_v1, 0.0 }
 0x298   :  { %v2124_v52 = vmul.f32 0.6931472, %v2897_v32  ;;  %v2145_v49 = vadd.f32 %v2121_v35, %v1889_v26  ;;  %v2176_v44 = vsub.f32 %v1872_v62, %v2160_v27  ;;  %v2191_v63 = vadd.f32 %v2190_v18, %v2175_v31 }
 0x299   :  { %v1873_v55 = vmul.f32 %v3912_v48, %v4322_v16  ;;  %vm1905_vm4 = vcmp.ne.f32.partialorder %v3912_v48, %v3912_v48  ;;  %vm2129_vm5 = vcmp.lt.f32.partialorder %v2128_v51, 0.0004427343  ;;  %v1874_v24 = vmul.f32 %v3958_v1, %v57_v41 }
 0x29a   :  { %v2130_v9 = vsel %vm2129_vm5, %v2127_v20, %v2124_v52  ;;  %v2161_v58 = vsel %vm1905_vm4, %v3912_v48, %v2145_v49  ;;  %v2192_v53 = vadd.f32 %v2191_v63, %v2176_v44  ;;  %vm1906_vm6 = vcmp.ne.f32.partialorder %v3958_v1, %v3958_v1 }
 0x29b   :  { %v2146_v2 = vadd.f32 %v2130_v9, %v1890_v13  ;;  %v2177_v45 = vsub.f32 %v1873_v55, %v2161_v58 }
 0x29d   :  { %v2162_v33 = vsel %vm1906_vm6, %v3958_v1, %v2146_v2  ;;  %v2193_v8 = vadd.f32 %v2192_v53, %v2177_v45 }
 0x29e   :  { %v2178_v42 = vsub.f32 %v1874_v24, %v2162_v33 }
 0x2a0   :  { %v2194_v23 = vadd.f32 %v2193_v8, %v2178_v42 }
 0x2a2   :  { %2195 = vadd.xlane.f32.xlu1 %v2194_v23 }
 0x2a3   :  { %2917 = shalt.err (!%p2914_p4)
}
 0x2a4   :  { %s2918_s4 = scalar_lea.hbm %s4272_s8, 256 }
 0x2a5   :  { %p2919_p5 = scmp.ne.s32.totalorder %s4272_s8, %s2918_s4  ;;  %p2922_p6 = scmp.lt.u32.totalorder %s2918_s4, %s4272_s8 }
 0x2a7   :  { %p2924_p7 = pnand %p2922_p6, %p2919_p5 }
 0x2a9   :  { %2927 = shalt.err (!%p2924_p7)
}
 0x2aa   :  { %s3002_s21 = smov 128   ;;  %s3003_s22 = smov 8  }
 0x2ab   :  { %2293 = dma.vmem_to_hbm [thread:$0]  %s2288_s1, 256, %s4272_s8, [#allocation5], %s3002_s21, %s3002_s21, %s3003_s22  }
 0x2ac   :  { %s3004_s3 = smov [#allocation6]  }
 0x2ad   :  { %s2299_s24 = sshll.u32 %s3004_s3, 4  ;;  %s2300_s24 = int_to_ptr.vmem [resolvable:$true] %s2299_s24 }
 0x2ae   :  { %s2928_s25 = scalar_lea.vmem %s2300_s24, 256  ;;  %p2933_p9 = scmp.lt.s32.totalorder %s2300_s24, %s2300_s24 }
 0x2af   :  { %p2929_p8 = scmp.ne.s32.totalorder %s2300_s24, %s2928_s25  ;;  %p2934_p10 = scmp.lt.s32.totalorder %s2928_s25, %s2928_s25 }
 0x2b1   :  { %p2935_p11 = por %p2934_p10, %p2933_p9 }
 0x2b3   :  { %p2936_p12 = pnand %p2935_p11, %p2929_p8 }
 0x2b5   :  { %2939 = shalt.err (!%p2936_p12)
}
 0x2b6   :  { %s2940_s28 = scalar_lea.hbm %s4273_s9, 256 }
 0x2b7   :  { %p2941_p13 = scmp.ne.s32.totalorder %s4273_s9, %s2940_s28  ;;  %p2944_p0 = scmp.lt.u32.totalorder %s2940_s28, %s4273_s9 }
 0x2b9   :  { %p2946_p1 = pnand %p2944_p0, %p2941_p13 }
 0x2bb   :  { %2949 = shalt.err (!%p2946_p1)
}
 0x2bc   :  { %2305 = dma.vmem_to_hbm [thread:$0]  %s2300_s24, 256, %s4273_s9, [#allocation5], %s3002_s21, %s3002_s21, %s3003_s22  }
 0x2bd   :  { %s3005_s14 = smov [#allocation7]  }
 0x2be   :  { %s2311_s15 = sshll.u32 %s3005_s14, 4  ;;  %s2312_s15 = int_to_ptr.vmem [resolvable:$true] %s2311_s15 }
 0x2bf   :  { %s2950_s0 = scalar_lea.vmem %s2312_s15, 256  ;;  %p2955_p3 = scmp.lt.s32.totalorder %s2312_s15, %s2312_s15 }
 0x2c0   :  { %p2951_p2 = scmp.ne.s32.totalorder %s2312_s15, %s2950_s0  ;;  %p2956_p4 = scmp.lt.s32.totalorder %s2950_s0, %s2950_s0 }
 0x2c2   :  { %p2957_p5 = por %p2956_p4, %p2955_p3 }
 0x2c4   :  { %p2958_p6 = pnand %p2957_p5, %p2951_p2 }
 0x2c6   :  { %2961 = shalt.err (!%p2958_p6)
}
 0x2c7   :  { %s2962_s2 = scalar_lea.hbm %s4274_s10, 256 }
 0x2c8   :  { %p2963_p7 = scmp.ne.s32.totalorder %s4274_s10, %s2962_s2  ;;  %p2966_p8 = scmp.lt.u32.totalorder %s2962_s2, %s4274_s10 }
 0x2ca   :  { %p2968_p9 = pnand %p2966_p8, %p2963_p7 }
 0x2cc   :  { %2971 = shalt.err (!%p2968_p9)
}
 0x2cd   :  { %2317 = dma.vmem_to_hbm [thread:$0]  %s2312_s15, 256, %s4274_s10, [#allocation8], %s3002_s21, %s3002_s21, %s3003_s22   ;;  %v4323_v5 = vld [vmem:[#allocation12_spill] sm:$0xff]  ;;  %v4324_v62 = vld [vmem:[#allocation13_spill] sm:$0xff] }
 0x2ce   :  { %s3006_s5 = smov [#allocation2]  }
 0x2cf   :  { %s2278_s23 = sshll.u32 %s3006_s5, 4  ;;  %s2279_s23 = int_to_ptr.vmem [resolvable:$true] %s2278_s23 }
 0x2d0   :  { %s2972_s6 = scalar_lea.vmem %s2279_s23, 32  ;;  %p2977_p11 = scmp.lt.s32.totalorder %s2279_s23, %s2279_s23 }
 0x2d1   :  { %p2973_p10 = scmp.ne.s32.totalorder %s2279_s23, %s2972_s6  ;;  %p2978_p12 = scmp.lt.s32.totalorder %s2972_s6, %s2972_s6 }
 0x2d3   :  { %p2979_p13 = por %p2978_p12, %p2977_p11 }
 0x2d5   :  { %p2980_p0 = pnand %p2979_p13, %p2973_p10 }
 0x321   :  { %v2187_v48 = vpop.xlane.xlu0 %2186 }
 0x322   :  { %v2242_v6 = vrot.slane %v2187_v48, %v4323_v5 }
 0x32f   :  { %v2196_v1 = vpop.xlane.xlu1 %2195 }
 0x330   :  { %v2247_v56 = vrot.slane %v2196_v1, %v4324_v62 }
 0x332   :  { %v2249_v4 = vsel %vm2248_vm1, %v2247_v56, %v2242_v6 }
 0x333   :  { %2252 = vst.msk [vmem:[#allocation2] sm:$0x1] %vm2251_vm2, %v2249_v4 }
 0x334   :  { %2983 = shalt.err (!%p2980_p0)
}
 0x335   :  { %s2984_s22 = scalar_lea.hbm %s4271_s7, 32 }
 0x336   :  { %p2985_p1 = scmp.ne.s32.totalorder %s4271_s7, %s2984_s22  ;;  %p2988_p2 = scmp.lt.u32.totalorder %s2984_s22, %s4271_s7 }
 0x338   :  { %p2990_p3 = pnand %p2988_p2, %p2985_p1 }
 0x33a   :  { %2993 = shalt.err (!%p2990_p3)
}
 0x33b   :  { %2281 = dma.vmem_to_hbm [thread:$0]  %s2279_s23, 32, %s4271_s7, [#allocation3]  }
 0x33c   :  { %2994 = dma.done.wait [#allocation3], 32  }
 0x33d   :  { %2995 = vsyncadd [#allocation3], 4294967264 }
 0x33e   :  { %2996 = dma.done.wait [#allocation5], 512  }
 0x33f   :  { %2997 = vsyncadd [#allocation5], 4294966784 }
 0x340   :  { %2998 = dma.done.wait [#allocation8], 256  }
 0x341   :  { %2999 = vsyncadd [#allocation8], 4294967040 }
 0x342   :  { %2330 = vsyncpa [#allocation3], 1 }
 0x343   :  { %2331 = vsyncpa [#allocation5], 1 }
 0x344   :  { %2332 = vsyncpa [#allocation8], 1 }

</bundles_post_ra>
